<compile_context>
chip_gen: v7x
topology: tpu7x:2x2x1
jax: 0.10.0
libtpu: 0.0.40
codegen_flags: <defaults>
</compile_context>

<pallas_src>
import functools

import jax
import jax.numpy as jnp
from jax.experimental import pallas as pl
from jax.experimental.pallas import tpu as pltpu


# -----------------------------------------------------------------------------
# Kernel: one grid step == t_tile sequential dm_echo3 timesteps.  States are
# carried in the resident (constant-index, aliased) output blocks between grid
# steps and in vregs (fori_loop carries) within a tile.
# -----------------------------------------------------------------------------
def _dm_echo3_tile_kernel(
    # inputs
    x_ref,
    u1_ref, h1_ref, u2_ref, h2_ref, u3_ref, h3_ref, s_ref,
    win1_ref, wrec1_ref, win2_ref, wrec2_ref, win3_ref, wrec3_ref,
    wdm1_ref, wdm2_ref, wdm3_ref,
    # outputs
    r_out, u1_out, h1_out, u2_out, h2_out, u3_out, h3_out, s_out,
    # scratch
    xw1_sc,
    *, t_tile, unroll, a1, a2, a3, adm, b1, b2, b3, bdm,
):
    f32 = jnp.float32
    to = pl.program_id(0)

    # Seed the resident, aliased state output blocks once (tile 0 only).  For
    # to > 0 they still hold the state written at the end of the previous tile.
    @pl.when(to == 0)
    def _init():
        u1_out[...] = u1_ref[...]
        h1_out[...] = h1_ref[...]
        u2_out[...] = u2_ref[...]
        h2_out[...] = h2_ref[...]
        u3_out[...] = u3_ref[...]
        h3_out[...] = h3_ref[...]
        s_out[...] = s_ref[...]

    # Hoisted layer-1 input projection for the whole tile: one big MXU matmul
    # (M = t_tile * B_pad) instead of t_tile tiny M = B_pad matmuls per step.
    t, bp, n_inp = x_ref.shape
    n_e1 = win1_ref.shape[1]
    x_flat = x_ref[...].reshape(t * bp, n_inp)          # merges sublane-tiled dims only
    xw1 = jnp.dot(x_flat, win1_ref[...], preferred_element_type=f32)
    xw1_sc[...] = xw1.reshape(t, bp, n_e1)

    def one_step(ti, carry):
        u1, h1, u2, h2, u3, h3, s = carry

        # Layer 1: precomputed input drive + recurrent drive.
        d1 = xw1_sc[ti] + jnp.dot(h1, wrec1_ref[...], preferred_element_type=f32)
        u1n = b1 * u1 + a1 * d1
        h1n = jnp.tanh(u1n)

        d2 = (jnp.dot(h1n, win2_ref[...], preferred_element_type=f32)
              + jnp.dot(h2, wrec2_ref[...], preferred_element_type=f32))
        u2n = b2 * u2 + a2 * d2
        h2n = jnp.tanh(u2n)

        d3 = (jnp.dot(h2n, win3_ref[...], preferred_element_type=f32)
              + jnp.dot(h3, wrec3_ref[...], preferred_element_type=f32))
        u3n = b3 * u3 + a3 * d3
        h3n = jnp.tanh(u3n)

        # torch.cat([h1,h2,h3], dim=1) @ W_dm == sum of per-block MXU dots.
        ddm = (jnp.dot(h1n, wdm1_ref[...], preferred_element_type=f32)
               + jnp.dot(h2n, wdm2_ref[...], preferred_element_type=f32)
               + jnp.dot(h3n, wdm3_ref[...], preferred_element_type=f32))
        sn = bdm * s + adm * ddm
        r_out[ti] = jnp.tanh(sn)       # accumulate into the (t_tile, B, n_dm) slab
        return (u1n, h1n, u2n, h2n, u3n, h3n, sn)

    def block_step(bi, carry):
        # Static inner unroll gives the LLO scheduler cross-step visibility.
        for j in range(unroll):
            carry = one_step(bi * unroll + j, carry)
        return carry

    carry0 = (u1_out[...], h1_out[...], u2_out[...], h2_out[...],
              u3_out[...], h3_out[...], s_out[...])
    u1f, h1f, u2f, h2f, u3f, h3f, sf = jax.lax.fori_loop(
        0, t_tile // unroll, block_step, carry0)

    # Write the carried state back into the resident output blocks so the next
    # grid step (and the final HBM writeback) sees it.
    u1_out[...] = u1f
    h1_out[...] = h1f
    u2_out[...] = u2f
    h2_out[...] = h2f
    u3_out[...] = u3f
    h3_out[...] = h3f
    s_out[...] = sf


def _pick_t_tile(T, max_tile=128):
    for d in range(min(T, max_tile), 0, -1):
        if T % d == 0:
            return d
    return 1


def _pick_unroll(t_tile, max_unroll=4):
    for u in range(min(max_unroll, t_tile), 0, -1):
        if t_tile % u == 0:
            return u
    return 1


def dm_echo3_forward_seq(params, x_seq, hid, *, alphas, t_tile=None, unroll=None):
    """Run T sequential steps of dm_echo3.forward(x_t, hid) with y=None.

    x_seq: (T, B, n_inp). hid = (u1, h1, u2, h2, u3, h3, s), each (B, n_*).
    Returns (r_seq: (T, B, n_dm), new_hid).
    """
    a1, a2, a3, adm = (float(a) for a in alphas)
    T, B, n_inp = x_seq.shape
    u1, h1, u2, h2, u3, h3, s = hid
    n_e1, n_e2, n_e3 = h1.shape[1], h2.shape[1], h3.shape[1]
    n_dm = s.shape[1]

    # Fill sublanes: pad batch up to a multiple of 8 (f32 vreg sublane count).
    # Padded rows are zero and stay zero through the recurrence (tanh(0)=0).
    B_pad = max(8, -(-B // 8) * 8)
    if B_pad != B:
        pad_b = lambda a: jnp.pad(a, ((0, B_pad - B), (0, 0)))
        x_seq = jnp.pad(x_seq, ((0, 0), (0, B_pad - B), (0, 0)))
        u1, h1, u2, h2, u3, h3, s = (pad_b(a) for a in (u1, h1, u2, h2, u3, h3, s))

    if t_tile is None:
        t_tile = _pick_t_tile(T)
    assert T % t_tile == 0, "T must be divisible by t_tile"
    if unroll is None:
        unroll = _pick_unroll(t_tile)
    assert t_tile % unroll == 0, "t_tile must be divisible by unroll"
    grid = (T // t_tile,)

    def const_spec(shape):
        nd = len(shape)
        return pl.BlockSpec(shape, lambda to, _nd=nd: (0,) * _nd)

    in_arrays = (
        x_seq, u1, h1, u2, h2, u3, h3, s,
        params["w_in1"], params["w_rec1"],
        params["w_in2"], params["w_rec2"],
        params["w_in3"], params["w_rec3"],
        params["w_dm1"], params["w_dm2"], params["w_dm3"],
    )
    in_specs = [pl.BlockSpec((t_tile, B_pad, n_inp), lambda to: (to, 0, 0))]
    in_specs += [const_spec(a.shape) for a in in_arrays[1:]]

    state_shapes = ((B_pad, n_e1), (B_pad, n_e1), (B_pad, n_e2), (B_pad, n_e2),
                    (B_pad, n_e3), (B_pad, n_e3), (B_pad, n_dm))
    out_specs = (
        pl.BlockSpec((t_tile, B_pad, n_dm), lambda to: (to, 0, 0)),
    ) + tuple(const_spec(sh) for sh in state_shapes)
    out_shape = (
        jax.ShapeDtypeStruct((T, B_pad, n_dm), jnp.float32),
    ) + tuple(jax.ShapeDtypeStruct(sh, jnp.float32) for sh in state_shapes)

    # Single scratch: the hoisted layer-1 input projection for the tile.
    scratch_shapes = [pltpu.VMEM((t_tile, B_pad, n_e1), jnp.float32)]

    kernel = functools.partial(
        _dm_echo3_tile_kernel,
        t_tile=t_tile, unroll=unroll,
        a1=a1, a2=a2, a3=a3, adm=adm,
        b1=1.0 - a1, b2=1.0 - a2, b3=1.0 - a3, bdm=1.0 - adm,
    )

    outs = pl.pallas_call(
        kernel,
        grid=grid,
        in_specs=in_specs,
        out_specs=out_specs,
        out_shape=out_shape,
        scratch_shapes=scratch_shapes,
        # P8: state inputs 1..7 alias state outputs 1..7 (carried in place).
        input_output_aliases={i: i for i in range(1, 8)},
        compiler_params=pltpu.CompilerParams(
            dimension_semantics=("arbitrary",)),
    )(*in_arrays)

    r_seq, u1n, h1n, u2n, h2n, u3n, h3n, s_new = outs
    if B_pad != B:
        r_seq = r_seq[:, :B]
        u1n, h1n, u2n, h2n, u3n, h3n, s_new = (
            a[:B] for a in (u1n, h1n, u2n, h2n, u3n, h3n, s_new))
    return r_seq, (u1n, h1n, u2n, h2n, u3n, h3n, s_new)


def dm_echo3_forward(params, x, hid, *, alphas):
    """Single-step forward matching dm_echo3.forward(x, hid) with y=None."""
    r_seq, new_hid = dm_echo3_forward_seq(params, x[None], hid, alphas=alphas)
    return r_seq[0], new_hid


# -----------------------------------------------------------------------------
# Pure-JAX reference (mirrors the PyTorch semantics) for correctness checking.
# -----------------------------------------------------------------------------
def dm_echo3_reference_step(params, alphas, x, hid):
    u1, h1, u2, h2, u3, h3, s = hid
    a1, a2, a3, adm = alphas

    def echo(inp, u, h, w_in, w_rec, alpha):
        u_new = (1.0 - alpha) * u + alpha * (inp @ w_in + h @ w_rec)
        return u_new, jnp.tanh(u_new)

    u1n, h1n = echo(x, u1, h1, params["w_in1"], params["w_rec1"], a1)
    u2n, h2n = echo(h1n, u2, h2, params["w_in2"], params["w_rec2"], a2)
    u3n, h3n = echo(h2n, u3, h3, params["w_in3"], params["w_rec3"], a3)
    h_cat = jnp.concatenate([h1n, h2n, h3n], axis=1)
    w_dm = jnp.concatenate([params["w_dm1"], params["w_dm2"], params["w_dm3"]], axis=0)
    s_new = (1.0 - adm) * s + adm * (h_cat @ w_dm)
    r_new = jnp.tanh(s_new)
    return r_new, (u1n, h1n, u2n, h2n, u3n, h3n, s_new)


def dm_echo3_reference_seq(params, alphas, x_seq, hid):
    def step(carry, x):
        r, new = dm_echo3_reference_step(params, alphas, x, carry)
        return new, r
    hid_final, r_seq = jax.lax.scan(step, hid, x_seq)
    return r_seq, hid_final


# -----------------------------------------------------------------------------
# Deterministic parameter / input construction.
# -----------------------------------------------------------------------------
def init_params(key, n_inp, n_e1, n_e2, n_e3, n_dm, scales, spars_ps):
    ks = jax.random.split(key, 10)

    def dense(k, nin, nout):
        return (jax.random.normal(k, (nin, nout), jnp.float32) / jnp.sqrt(nin)).astype(jnp.float32)

    def sparse_rec(k, n, scale, p):
        kw, km = jax.random.split(k)
        w = jax.random.normal(kw, (n, n), jnp.float32)
        mask = (jax.random.uniform(km, (n, n)) < p).astype(jnp.float32)
        return (w * mask * scale / jnp.sqrt(p * n)).astype(jnp.float32)

    return {
        "w_in1": dense(ks[0], n_inp, n_e1),
        "w_rec1": sparse_rec(ks[1], n_e1, scales[0], spars_ps[0]),
        "w_in2": dense(ks[2], n_e1, n_e2),
        "w_rec2": sparse_rec(ks[3], n_e2, scales[1], spars_ps[1]),
        "w_in3": dense(ks[4], n_e2, n_e3),
        "w_rec3": sparse_rec(ks[5], n_e3, scales[2], spars_ps[2]),
        # DM readout over concat([h1,h2,h3]) split into per-layer blocks
        "w_dm1": dense(ks[6], n_e1, n_dm),
        "w_dm2": dense(ks[7], n_e2, n_dm),
        "w_dm3": dense(ks[8], n_e3, n_dm),
    }


if __name__ == "__main__":
    # Small, module-consistent sizes: x_seq is (T, batch, n_inp); hidden states
    # are (batch, n_echo*) and (batch, n_dm).  batch=8 fills f32 sublanes.
    T, batch, n_inp = 32, 8, 8
    n_e1, n_e2, n_e3, n_dm = 32, 48, 64, 16

    echo_dict1 = dict(tau=10.0, dt=1.0, scale=0.9, spars_p=0.2)
    echo_dict2 = dict(tau=8.0, dt=1.0, scale=0.8, spars_p=0.2)
    echo_dict3 = dict(tau=6.0, dt=1.0, scale=0.7, spars_p=0.2)
    dm_dict = dict(tau=20.0, dt=1.0)

    alphas = (
        echo_dict1["dt"] / echo_dict1["tau"],
        echo_dict2["dt"] / echo_dict2["tau"],
        echo_dict3["dt"] / echo_dict3["tau"],
        dm_dict["dt"] / dm_dict["tau"],
    )

    key = jax.random.PRNGKey(0)
    kp, kx, kh = jax.random.split(key, 3)
    params = init_params(
        kp, n_inp, n_e1, n_e2, n_e3, n_dm,
        scales=(echo_dict1["scale"], echo_dict2["scale"], echo_dict3["scale"]),
        spars_ps=(echo_dict1["spars_p"], echo_dict2["spars_p"], echo_dict3["spars_p"]),
    )

    x_seq = jax.random.normal(kx, (T, batch, n_inp), jnp.float32)
    khs = jax.random.split(kh, 7)
    hid = (
        0.1 * jax.random.normal(khs[0], (batch, n_e1), jnp.float32),  # u_echo1
        0.1 * jax.random.normal(khs[1], (batch, n_e1), jnp.float32),  # h_echo1
        0.1 * jax.random.normal(khs[2], (batch, n_e2), jnp.float32),  # u_echo2
        0.1 * jax.random.normal(khs[3], (batch, n_e2), jnp.float32),  # h_echo2
        0.1 * jax.random.normal(khs[4], (batch, n_e3), jnp.float32),  # u_echo3
        0.1 * jax.random.normal(khs[5], (batch, n_e3), jnp.float32),  # h_echo3
        0.1 * jax.random.normal(khs[6], (batch, n_dm), jnp.float32),  # s_dm
    )

    # Reference first.
    r_ref, hid_ref = dm_echo3_reference_seq(params, alphas, x_seq, hid)
    jax.block_until_ready((r_ref, hid_ref))

    # 1) Default tiling: whole T=32 sequence in one grid step (t_tile=32).
    fwd = jax.jit(functools.partial(dm_echo3_forward_seq, alphas=alphas))
    r_seq, hid_new = fwd(params, x_seq, hid)
    jax.block_until_ready((r_seq, hid_new))
    for a, b in zip((r_seq, *hid_new), (r_ref, *hid_ref)):
        assert a.shape == b.shape
        assert jnp.allclose(a, b, atol=1e-4, rtol=1e-3), "mismatch vs reference (default tile)"

    # 2) Multi-tile path: t_tile=8 -> grid of 4, state carried across grid steps
    #    in the resident aliased output blocks.
    fwd_t8 = jax.jit(functools.partial(dm_echo3_forward_seq, alphas=alphas,
                                       t_tile=8, unroll=4))
    r_seq8, hid_new8 = fwd_t8(params, x_seq, hid)
    jax.block_until_ready((r_seq8, hid_new8))
    for a, b in zip((r_seq8, *hid_new8), (r_ref, *hid_ref)):
        assert a.shape == b.shape
        assert jnp.allclose(a, b, atol=1e-4, rtol=1e-3), "mismatch vs reference (t_tile=8)"

    print("KERNEL_OK")
</pallas_src>

<mosaic_0001>
module attributes {stable_mosaic.version = 11 : i64} {
  func.func @_dm_echo3_tile_kernel(%arg0: i32, %arg1: memref<32x8x8xf32, #tpu.memory_space<vmem>>, %arg2: memref<8x32xf32, #tpu.memory_space<vmem>>, %arg3: memref<8x32xf32, #tpu.memory_space<vmem>>, %arg4: memref<8x48xf32, #tpu.memory_space<vmem>>, %arg5: memref<8x48xf32, #tpu.memory_space<vmem>>, %arg6: memref<8x64xf32, #tpu.memory_space<vmem>>, %arg7: memref<8x64xf32, #tpu.memory_space<vmem>>, %arg8: memref<8x16xf32, #tpu.memory_space<vmem>>, %arg9: memref<8x32xf32, #tpu.memory_space<vmem>>, %arg10: memref<32x32xf32, #tpu.memory_space<vmem>>, %arg11: memref<32x48xf32, #tpu.memory_space<vmem>>, %arg12: memref<48x48xf32, #tpu.memory_space<vmem>>, %arg13: memref<48x64xf32, #tpu.memory_space<vmem>>, %arg14: memref<64x64xf32, #tpu.memory_space<vmem>>, %arg15: memref<32x16xf32, #tpu.memory_space<vmem>>, %arg16: memref<48x16xf32, #tpu.memory_space<vmem>>, %arg17: memref<64x16xf32, #tpu.memory_space<vmem>>, %arg18: memref<32x8x16xf32, #tpu.memory_space<vmem>>, %arg19: memref<8x32xf32, #tpu.memory_space<vmem>>, %arg20: memref<8x32xf32, #tpu.memory_space<vmem>>, %arg21: memref<8x48xf32, #tpu.memory_space<vmem>>, %arg22: memref<8x48xf32, #tpu.memory_space<vmem>>, %arg23: memref<8x64xf32, #tpu.memory_space<vmem>>, %arg24: memref<8x64xf32, #tpu.memory_space<vmem>>, %arg25: memref<8x16xf32, #tpu.memory_space<vmem>>, %arg26: memref<32x8x32xf32, #tpu.memory_space<vmem>>) attributes {dimension_semantics = [#tpu.dimension_semantics<arbitrary>], iteration_bounds = array<i64: 1>, scalar_prefetch = 0 : i64, scratch_operands = 1 : i64, tpu.core_type = #tpu.core_type<tc>, window_params = [{transform_indices = @transform_0, window_bounds = array<i64: 32, 8, 8>}, {pipeline_mode = #tpu.pipeline_mode<synchronous>, transform_indices = @transform_1, window_bounds = array<i64: 8, 32>}, {pipeline_mode = #tpu.pipeline_mode<synchronous>, transform_indices = @transform_2, window_bounds = array<i64: 8, 32>}, {pipeline_mode = #tpu.pipeline_mode<synchronous>, transform_indices = @transform_3, window_bounds = array<i64: 8, 48>}, {pipeline_mode = #tpu.pipeline_mode<synchronous>, transform_indices = @transform_4, window_bounds = array<i64: 8, 48>}, {pipeline_mode = #tpu.pipeline_mode<synchronous>, transform_indices = @transform_5, window_bounds = array<i64: 8, 64>}, {pipeline_mode = #tpu.pipeline_mode<synchronous>, transform_indices = @transform_6, window_bounds = array<i64: 8, 64>}, {pipeline_mode = #tpu.pipeline_mode<synchronous>, transform_indices = @transform_7, window_bounds = array<i64: 8, 16>}, {pipeline_mode = #tpu.pipeline_mode<synchronous>, transform_indices = @transform_8, window_bounds = array<i64: 8, 32>}, {pipeline_mode = #tpu.pipeline_mode<synchronous>, transform_indices = @transform_9, window_bounds = array<i64: 32, 32>}, {pipeline_mode = #tpu.pipeline_mode<synchronous>, transform_indices = @transform_10, window_bounds = array<i64: 32, 48>}, {pipeline_mode = #tpu.pipeline_mode<synchronous>, transform_indices = @transform_11, window_bounds = array<i64: 48, 48>}, {pipeline_mode = #tpu.pipeline_mode<synchronous>, transform_indices = @transform_12, window_bounds = array<i64: 48, 64>}, {pipeline_mode = #tpu.pipeline_mode<synchronous>, transform_indices = @transform_13, window_bounds = array<i64: 64, 64>}, {pipeline_mode = #tpu.pipeline_mode<synchronous>, transform_indices = @transform_14, window_bounds = array<i64: 32, 16>}, {pipeline_mode = #tpu.pipeline_mode<synchronous>, transform_indices = @transform_15, window_bounds = array<i64: 48, 16>}, {pipeline_mode = #tpu.pipeline_mode<synchronous>, transform_indices = @transform_16, window_bounds = array<i64: 64, 16>}, {transform_indices = @transform_17, window_bounds = array<i64: 32, 8, 16>}, {pipeline_mode = #tpu.pipeline_mode<synchronous>, transform_indices = @transform_18, window_bounds = array<i64: 8, 32>}, {pipeline_mode = #tpu.pipeline_mode<synchronous>, transform_indices = @transform_19, window_bounds = array<i64: 8, 32>}, {pipeline_mode = #tpu.pipeline_mode<synchronous>, transform_indices = @transform_20, window_bounds = array<i64: 8, 48>}, {pipeline_mode = #tpu.pipeline_mode<synchronous>, transform_indices = @transform_21, window_bounds = array<i64: 8, 48>}, {pipeline_mode = #tpu.pipeline_mode<synchronous>, transform_indices = @transform_22, window_bounds = array<i64: 8, 64>}, {pipeline_mode = #tpu.pipeline_mode<synchronous>, transform_indices = @transform_23, window_bounds = array<i64: 8, 64>}, {pipeline_mode = #tpu.pipeline_mode<synchronous>, transform_indices = @transform_24, window_bounds = array<i64: 8, 16>}]} {
    %c0_i32 = arith.constant 0 : i32
    %0 = arith.cmpi eq, %arg0, %c0_i32 : i32
    %1 = arith.extui %0 : i1 to i32
    %c0_i32_0 = arith.constant 0 : i32
    %2 = arith.cmpi ne, %1, %c0_i32_0 : i32
    scf.if %2 {
      %c0_38 = arith.constant 0 : index
      %c0_39 = arith.constant 0 : index
      %25 = vector.load %arg2[%c0_38, %c0_39] : memref<8x32xf32, #tpu.memory_space<vmem>>, vector<8x32xf32>
      %c0_40 = arith.constant 0 : index
      %c0_41 = arith.constant 0 : index
      %26 = vector.load %arg19[%c0_40, %c0_41] : memref<8x32xf32, #tpu.memory_space<vmem>>, vector<8x32xf32>
      tpu.vector_store %arg19[%c0_40, %c0_41], %25 {strides = array<i32>} : memref<8x32xf32, #tpu.memory_space<vmem>>, vector<8x32xf32>,
      %c0_42 = arith.constant 0 : index
      %c0_43 = arith.constant 0 : index
      %27 = vector.load %arg3[%c0_42, %c0_43] : memref<8x32xf32, #tpu.memory_space<vmem>>, vector<8x32xf32>
      %c0_44 = arith.constant 0 : index
      %c0_45 = arith.constant 0 : index
      %28 = vector.load %arg20[%c0_44, %c0_45] : memref<8x32xf32, #tpu.memory_space<vmem>>, vector<8x32xf32>
      tpu.vector_store %arg20[%c0_44, %c0_45], %27 {strides = array<i32>} : memref<8x32xf32, #tpu.memory_space<vmem>>, vector<8x32xf32>,
      %c0_46 = arith.constant 0 : index
      %c0_47 = arith.constant 0 : index
      %29 = vector.load %arg4[%c0_46, %c0_47] : memref<8x48xf32, #tpu.memory_space<vmem>>, vector<8x48xf32>
      %c0_48 = arith.constant 0 : index
      %c0_49 = arith.constant 0 : index
      %30 = vector.load %arg21[%c0_48, %c0_49] : memref<8x48xf32, #tpu.memory_space<vmem>>, vector<8x48xf32>
      tpu.vector_store %arg21[%c0_48, %c0_49], %29 {strides = array<i32>} : memref<8x48xf32, #tpu.memory_space<vmem>>, vector<8x48xf32>,
      %c0_50 = arith.constant 0 : index
      %c0_51 = arith.constant 0 : index
      %31 = vector.load %arg5[%c0_50, %c0_51] : memref<8x48xf32, #tpu.memory_space<vmem>>, vector<8x48xf32>
      %c0_52 = arith.constant 0 : index
      %c0_53 = arith.constant 0 : index
      %32 = vector.load %arg22[%c0_52, %c0_53] : memref<8x48xf32, #tpu.memory_space<vmem>>, vector<8x48xf32>
      tpu.vector_store %arg22[%c0_52, %c0_53], %31 {strides = array<i32>} : memref<8x48xf32, #tpu.memory_space<vmem>>, vector<8x48xf32>,
      %c0_54 = arith.constant 0 : index
      %c0_55 = arith.constant 0 : index
      %33 = vector.load %arg6[%c0_54, %c0_55] : memref<8x64xf32, #tpu.memory_space<vmem>>, vector<8x64xf32>
      %c0_56 = arith.constant 0 : index
      %c0_57 = arith.constant 0 : index
      %34 = vector.load %arg23[%c0_56, %c0_57] : memref<8x64xf32, #tpu.memory_space<vmem>>, vector<8x64xf32>
      tpu.vector_store %arg23[%c0_56, %c0_57], %33 {strides = array<i32>} : memref<8x64xf32, #tpu.memory_space<vmem>>, vector<8x64xf32>,
      %c0_58 = arith.constant 0 : index
      %c0_59 = arith.constant 0 : index
      %35 = vector.load %arg7[%c0_58, %c0_59] : memref<8x64xf32, #tpu.memory_space<vmem>>, vector<8x64xf32>
      %c0_60 = arith.constant 0 : index
      %c0_61 = arith.constant 0 : index
      %36 = vector.load %arg24[%c0_60, %c0_61] : memref<8x64xf32, #tpu.memory_space<vmem>>, vector<8x64xf32>
      tpu.vector_store %arg24[%c0_60, %c0_61], %35 {strides = array<i32>} : memref<8x64xf32, #tpu.memory_space<vmem>>, vector<8x64xf32>,
      %c0_62 = arith.constant 0 : index
      %c0_63 = arith.constant 0 : index
      %37 = vector.load %arg8[%c0_62, %c0_63] : memref<8x16xf32, #tpu.memory_space<vmem>>, vector<8x16xf32>
      %c0_64 = arith.constant 0 : index
      %c0_65 = arith.constant 0 : index
      %38 = vector.load %arg25[%c0_64, %c0_65] : memref<8x16xf32, #tpu.memory_space<vmem>>, vector<8x16xf32>
      tpu.vector_store %arg25[%c0_64, %c0_65], %37 {strides = array<i32>} : memref<8x16xf32, #tpu.memory_space<vmem>>, vector<8x16xf32>,
    } else {
    }
    %c0 = arith.constant 0 : index
    %c0_1 = arith.constant 0 : index
    %c0_2 = arith.constant 0 : index
    %3 = vector.load %arg1[%c0, %c0_1, %c0_2] : memref<32x8x8xf32, #tpu.memory_space<vmem>>, vector<32x8x8xf32>
    %4 = vector.shape_cast %3 : vector<32x8x8xf32> to vector<256x8xf32>
    %c0_3 = arith.constant 0 : index
    %c0_4 = arith.constant 0 : index
    %5 = vector.load %arg9[%c0_3, %c0_4] : memref<8x32xf32, #tpu.memory_space<vmem>>, vector<8x32xf32>
    %cst = arith.constant dense<0.000000e+00> : vector<256x32xf32>
    %6 = tpu.matmul %4, %5, %cst {dimension_numbers = #tpu.dot_dimension_numbers<[1], [0], [0], [1], [0, 0, 1, 1], [], []>} : vector<256x8xf32>, vector<8x32xf32>, vector<256x32xf32> -> vector<256x32xf32>
    %7 = vector.shape_cast %6 : vector<256x32xf32> to vector<32x8x32xf32>
    %c0_5 = arith.constant 0 : index
    %c0_6 = arith.constant 0 : index
    %c0_7 = arith.constant 0 : index
    %8 = vector.load %arg26[%c0_5, %c0_6, %c0_7] : memref<32x8x32xf32, #tpu.memory_space<vmem>>, vector<32x8x32xf32>
    tpu.vector_store %arg26[%c0_5, %c0_6, %c0_7], %7 {strides = array<i32>} : memref<32x8x32xf32, #tpu.memory_space<vmem>>, vector<32x8x32xf32>,
    %c0_8 = arith.constant 0 : index
    %c0_9 = arith.constant 0 : index
    %9 = vector.load %arg19[%c0_8, %c0_9] : memref<8x32xf32, #tpu.memory_space<vmem>>, vector<8x32xf32>
    %c0_10 = arith.constant 0 : index
    %c0_11 = arith.constant 0 : index
    %10 = vector.load %arg20[%c0_10, %c0_11] : memref<8x32xf32, #tpu.memory_space<vmem>>, vector<8x32xf32>
    %c0_12 = arith.constant 0 : index
    %c0_13 = arith.constant 0 : index
    %11 = vector.load %arg21[%c0_12, %c0_13] : memref<8x48xf32, #tpu.memory_space<vmem>>, vector<8x48xf32>
    %c0_14 = arith.constant 0 : index
    %c0_15 = arith.constant 0 : index
    %12 = vector.load %arg22[%c0_14, %c0_15] : memref<8x48xf32, #tpu.memory_space<vmem>>, vector<8x48xf32>
    %c0_16 = arith.constant 0 : index
    %c0_17 = arith.constant 0 : index
    %13 = vector.load %arg23[%c0_16, %c0_17] : memref<8x64xf32, #tpu.memory_space<vmem>>, vector<8x64xf32>
    %c0_18 = arith.constant 0 : index
    %c0_19 = arith.constant 0 : index
    %14 = vector.load %arg24[%c0_18, %c0_19] : memref<8x64xf32, #tpu.memory_space<vmem>>, vector<8x64xf32>
    %c0_20 = arith.constant 0 : index
    %c0_21 = arith.constant 0 : index
    %15 = vector.load %arg25[%c0_20, %c0_21] : memref<8x16xf32, #tpu.memory_space<vmem>>, vector<8x16xf32>
    %c0_i32_22 = arith.constant 0 : i32
    %c8_i32 = arith.constant 8 : i32
    %16 = arith.addi %c0_i32_22, %c8_i32 : i32
    %c1_i32 = arith.constant 1 : i32
    %17:7 = scf.for %arg27 = %c0_i32_22 to %16 step %c1_i32 iter_args(%arg28 = %9, %arg29 = %10, %arg30 = %11, %arg31 = %12, %arg32 = %13, %arg33 = %14, %arg34 = %15) -> (vector<8x32xf32>, vector<8x32xf32>, vector<8x48xf32>, vector<8x48xf32>, vector<8x64xf32>, vector<8x64xf32>, vector<8x16xf32>)  : i32 {
      %c4_i32 = arith.constant 4 : i32
      %25 = arith.muli %arg27, %c4_i32 : i32
      %c0_i32_38 = arith.constant 0 : i32
      %26 = arith.addi %25, %c0_i32_38 : i32
      %27 = arith.index_cast %26 : i32 to index
      %c0_39 = arith.constant 0 : index
      %c0_40 = arith.constant 0 : index
      %28 = vector.load %arg26[%27, %c0_39, %c0_40] : memref<32x8x32xf32, #tpu.memory_space<vmem>>, vector<1x8x32xf32>
      %29 = vector.shape_cast %28 : vector<1x8x32xf32> to vector<8x32xf32>
      %c0_41 = arith.constant 0 : index
      %c0_42 = arith.constant 0 : index
      %30 = vector.load %arg10[%c0_41, %c0_42] : memref<32x32xf32, #tpu.memory_space<vmem>>, vector<32x32xf32>
      %cst_43 = arith.constant dense<0.000000e+00> : vector<8x32xf32>
      %31 = tpu.matmul %arg29, %30, %cst_43 {dimension_numbers = #tpu.dot_dimension_numbers<[1], [0], [0], [1], [0, 0, 1, 1], [], []>} : vector<8x32xf32>, vector<32x32xf32>, vector<8x32xf32> -> vector<8x32xf32>
      %32 = arith.addf %29, %31 : vector<8x32xf32>
      %cst_44 = arith.constant 0.899999976 : f32
      %33 = vector.broadcast %cst_44 : f32 to vector<8x32xf32>
      %34 = arith.mulf %33, %arg28 : vector<8x32xf32>
      %cst_45 = arith.constant 1.000000e-01 : f32
      %35 = vector.broadcast %cst_45 : f32 to vector<8x32xf32>
      %36 = arith.mulf %35, %32 : vector<8x32xf32>
      %37 = arith.addf %34, %36 : vector<8x32xf32>
      %38 = math.tanh %37 : vector<8x32xf32>
      %c0_46 = arith.constant 0 : index
      %c0_47 = arith.constant 0 : index
      %39 = vector.load %arg11[%c0_46, %c0_47] : memref<32x48xf32, #tpu.memory_space<vmem>>, vector<32x48xf32>
      %cst_48 = arith.constant dense<0.000000e+00> : vector<8x48xf32>
      %40 = tpu.matmul %38, %39, %cst_48 {dimension_numbers = #tpu.dot_dimension_numbers<[1], [0], [0], [1], [0, 0, 1, 1], [], []>} : vector<8x32xf32>, vector<32x48xf32>, vector<8x48xf32> -> vector<8x48xf32>
      %c0_49 = arith.constant 0 : index
      %c0_50 = arith.constant 0 : index
      %41 = vector.load %arg12[%c0_49, %c0_50] : memref<48x48xf32, #tpu.memory_space<vmem>>, vector<48x48xf32>
      %cst_51 = arith.constant dense<0.000000e+00> : vector<8x48xf32>
      %42 = tpu.matmul %arg31, %41, %cst_51 {dimension_numbers = #tpu.dot_dimension_numbers<[1], [0], [0], [1], [0, 0, 1, 1], [], []>} : vector<8x48xf32>, vector<48x48xf32>, vector<8x48xf32> -> vector<8x48xf32>
      %43 = arith.addf %40, %42 : vector<8x48xf32>
      %cst_52 = arith.constant 8.750000e-01 : f32
      %44 = vector.broadcast %cst_52 : f32 to vector<8x48xf32>
      %45 = arith.mulf %44, %arg30 : vector<8x48xf32>
      %cst_53 = arith.constant 1.250000e-01 : f32
      %46 = vector.broadcast %cst_53 : f32 to vector<8x48xf32>
      %47 = arith.mulf %46, %43 : vector<8x48xf32>
      %48 = arith.addf %45, %47 : vector<8x48xf32>
      %49 = math.tanh %48 : vector<8x48xf32>
      %c0_54 = arith.constant 0 : index
      %c0_55 = arith.constant 0 : index
      %50 = vector.load %arg13[%c0_54, %c0_55] : memref<48x64xf32, #tpu.memory_space<vmem>>, vector<48x64xf32>
      %cst_56 = arith.constant dense<0.000000e+00> : vector<8x64xf32>
      %51 = tpu.matmul %49, %50, %cst_56 {dimension_numbers = #tpu.dot_dimension_numbers<[1], [0], [0], [1], [0, 0, 1, 1], [], []>} : vector<8x48xf32>, vector<48x64xf32>, vector<8x64xf32> -> vector<8x64xf32>
      %c0_57 = arith.constant 0 : index
      %c0_58 = arith.constant 0 : index
      %52 = vector.load %arg14[%c0_57, %c0_58] : memref<64x64xf32, #tpu.memory_space<vmem>>, vector<64x64xf32>
      %cst_59 = arith.constant dense<0.000000e+00> : vector<8x64xf32>
      %53 = tpu.matmul %arg33, %52, %cst_59 {dimension_numbers = #tpu.dot_dimension_numbers<[1], [0], [0], [1], [0, 0, 1, 1], [], []>} : vector<8x64xf32>, vector<64x64xf32>, vector<8x64xf32> -> vector<8x64xf32>
      %54 = arith.addf %51, %53 : vector<8x64xf32>
      %cst_60 = arith.constant 0.833333313 : f32
      %55 = vector.broadcast %cst_60 : f32 to vector<8x64xf32>
      %56 = arith.mulf %55, %arg32 : vector<8x64xf32>
      %cst_61 = arith.constant 0.166666672 : f32
      %57 = vector.broadcast %cst_61 : f32 to vector<8x64xf32>
      %58 = arith.mulf %57, %54 : vector<8x64xf32>
      %59 = arith.addf %56, %58 : vector<8x64xf32>
      %60 = math.tanh %59 : vector<8x64xf32>
      %c0_62 = arith.constant 0 : index
      %c0_63 = arith.constant 0 : index
      %61 = vector.load %arg15[%c0_62, %c0_63] : memref<32x16xf32, #tpu.memory_space<vmem>>, vector<32x16xf32>
      %cst_64 = arith.constant dense<0.000000e+00> : vector<8x16xf32>
      %62 = tpu.matmul %38, %61, %cst_64 {dimension_numbers = #tpu.dot_dimension_numbers<[1], [0], [0], [1], [0, 0, 1, 1], [], []>} : vector<8x32xf32>, vector<32x16xf32>, vector<8x16xf32> -> vector<8x16xf32>
      %c0_65 = arith.constant 0 : index
      %c0_66 = arith.constant 0 : index
      %63 = vector.load %arg16[%c0_65, %c0_66] : memref<48x16xf32, #tpu.memory_space<vmem>>, vector<48x16xf32>
      %cst_67 = arith.constant dense<0.000000e+00> : vector<8x16xf32>
      %64 = tpu.matmul %49, %63, %cst_67 {dimension_numbers = #tpu.dot_dimension_numbers<[1], [0], [0], [1], [0, 0, 1, 1], [], []>} : vector<8x48xf32>, vector<48x16xf32>, vector<8x16xf32> -> vector<8x16xf32>
      %65 = arith.addf %62, %64 : vector<8x16xf32>
      %c0_68 = arith.constant 0 : index
      %c0_69 = arith.constant 0 : index
      %66 = vector.load %arg17[%c0_68, %c0_69] : memref<64x16xf32, #tpu.memory_space<vmem>>, vector<64x16xf32>
      %cst_70 = arith.constant dense<0.000000e+00> : vector<8x16xf32>
      %67 = tpu.matmul %60, %66, %cst_70 {dimension_numbers = #tpu.dot_dimension_numbers<[1], [0], [0], [1], [0, 0, 1, 1], [], []>} : vector<8x64xf32>, vector<64x16xf32>, vector<8x16xf32> -> vector<8x16xf32>
      %68 = arith.addf %65, %67 : vector<8x16xf32>
      %cst_71 = arith.constant 0.949999988 : f32
      %69 = vector.broadcast %cst_71 : f32 to vector<8x16xf32>
      %70 = arith.mulf %69, %arg34 : vector<8x16xf32>
      %cst_72 = arith.constant 5.000000e-02 : f32
      %71 = vector.broadcast %cst_72 : f32 to vector<8x16xf32>
      %72 = arith.mulf %71, %68 : vector<8x16xf32>
      %73 = arith.addf %70, %72 : vector<8x16xf32>
      %74 = math.tanh %73 : vector<8x16xf32>
      %75 = arith.index_cast %26 : i32 to index
      %c0_73 = arith.constant 0 : index
      %c0_74 = arith.constant 0 : index
      %76 = vector.load %arg18[%75, %c0_73, %c0_74] : memref<32x8x16xf32, #tpu.memory_space<vmem>>, vector<1x8x16xf32>
      %77 = vector.shape_cast %76 : vector<1x8x16xf32> to vector<8x16xf32>
      %78 = vector.shape_cast %74 : vector<8x16xf32> to vector<1x8x16xf32>
      tpu.vector_store %arg18[%75, %c0_73, %c0_74], %78 {strides = array<i32>} : memref<32x8x16xf32, #tpu.memory_space<vmem>>, vector<1x8x16xf32>,
      %c4_i32_75 = arith.constant 4 : i32
      %79 = arith.muli %arg27, %c4_i32_75 : i32
      %c1_i32_76 = arith.constant 1 : i32
      %80 = arith.addi %79, %c1_i32_76 : i32
      %81 = arith.index_cast %80 : i32 to index
      %c0_77 = arith.constant 0 : index
      %c0_78 = arith.constant 0 : index
      %82 = vector.load %arg26[%81, %c0_77, %c0_78] : memref<32x8x32xf32, #tpu.memory_space<vmem>>, vector<1x8x32xf32>
      %83 = vector.shape_cast %82 : vector<1x8x32xf32> to vector<8x32xf32>
      %c0_79 = arith.constant 0 : index
      %c0_80 = arith.constant 0 : index
      %84 = vector.load %arg10[%c0_79, %c0_80] : memref<32x32xf32, #tpu.memory_space<vmem>>, vector<32x32xf32>
      %cst_81 = arith.constant dense<0.000000e+00> : vector<8x32xf32>
      %85 = tpu.matmul %38, %84, %cst_81 {dimension_numbers = #tpu.dot_dimension_numbers<[1], [0], [0], [1], [0, 0, 1, 1], [], []>} : vector<8x32xf32>, vector<32x32xf32>, vector<8x32xf32> -> vector<8x32xf32>
      %86 = arith.addf %83, %85 : vector<8x32xf32>
      %cst_82 = arith.constant 0.899999976 : f32
      %87 = vector.broadcast %cst_82 : f32 to vector<8x32xf32>
      %88 = arith.mulf %87, %37 : vector<8x32xf32>
      %cst_83 = arith.constant 1.000000e-01 : f32
      %89 = vector.broadcast %cst_83 : f32 to vector<8x32xf32>
      %90 = arith.mulf %89, %86 : vector<8x32xf32>
      %91 = arith.addf %88, %90 : vector<8x32xf32>
      %92 = math.tanh %91 : vector<8x32xf32>
      %c0_84 = arith.constant 0 : index
      %c0_85 = arith.constant 0 : index
      %93 = vector.load %arg11[%c0_84, %c0_85] : memref<32x48xf32, #tpu.memory_space<vmem>>, vector<32x48xf32>
      %cst_86 = arith.constant dense<0.000000e+00> : vector<8x48xf32>
      %94 = tpu.matmul %92, %93, %cst_86 {dimension_numbers = #tpu.dot_dimension_numbers<[1], [0], [0], [1], [0, 0, 1, 1], [], []>} : vector<8x32xf32>, vector<32x48xf32>, vector<8x48xf32> -> vector<8x48xf32>
      %c0_87 = arith.constant 0 : index
      %c0_88 = arith.constant 0 : index
      %95 = vector.load %arg12[%c0_87, %c0_88] : memref<48x48xf32, #tpu.memory_space<vmem>>, vector<48x48xf32>
      %cst_89 = arith.constant dense<0.000000e+00> : vector<8x48xf32>
      %96 = tpu.matmul %49, %95, %cst_89 {dimension_numbers = #tpu.dot_dimension_numbers<[1], [0], [0], [1], [0, 0, 1, 1], [], []>} : vector<8x48xf32>, vector<48x48xf32>, vector<8x48xf32> -> vector<8x48xf32>
      %97 = arith.addf %94, %96 : vector<8x48xf32>
      %cst_90 = arith.constant 8.750000e-01 : f32
      %98 = vector.broadcast %cst_90 : f32 to vector<8x48xf32>
      %99 = arith.mulf %98, %48 : vector<8x48xf32>
      %cst_91 = arith.constant 1.250000e-01 : f32
      %100 = vector.broadcast %cst_91 : f32 to vector<8x48xf32>
      %101 = arith.mulf %100, %97 : vector<8x48xf32>
      %102 = arith.addf %99, %101 : vector<8x48xf32>
      %103 = math.tanh %102 : vector<8x48xf32>
      %c0_92 = arith.constant 0 : index
      %c0_93 = arith.constant 0 : index
      %104 = vector.load %arg13[%c0_92, %c0_93] : memref<48x64xf32, #tpu.memory_space<vmem>>, vector<48x64xf32>
      %cst_94 = arith.constant dense<0.000000e+00> : vector<8x64xf32>
      %105 = tpu.matmul %103, %104, %cst_94 {dimension_numbers = #tpu.dot_dimension_numbers<[1], [0], [0], [1], [0, 0, 1, 1], [], []>} : vector<8x48xf32>, vector<48x64xf32>, vector<8x64xf32> -> vector<8x64xf32>
      %c0_95 = arith.constant 0 : index
      %c0_96 = arith.constant 0 : index
      %106 = vector.load %arg14[%c0_95, %c0_96] : memref<64x64xf32, #tpu.memory_space<vmem>>, vector<64x64xf32>
      %cst_97 = arith.constant dense<0.000000e+00> : vector<8x64xf32>
      %107 = tpu.matmul %60, %106, %cst_97 {dimension_numbers = #tpu.dot_dimension_numbers<[1], [0], [0], [1], [0, 0, 1, 1], [], []>} : vector<8x64xf32>, vector<64x64xf32>, vector<8x64xf32> -> vector<8x64xf32>
      %108 = arith.addf %105, %107 : vector<8x64xf32>
      %cst_98 = arith.constant 0.833333313 : f32
      %109 = vector.broadcast %cst_98 : f32 to vector<8x64xf32>
      %110 = arith.mulf %109, %59 : vector<8x64xf32>
      %cst_99 = arith.constant 0.166666672 : f32
      %111 = vector.broadcast %cst_99 : f32 to vector<8x64xf32>
      %112 = arith.mulf %111, %108 : vector<8x64xf32>
      %113 = arith.addf %110, %112 : vector<8x64xf32>
      %114 = math.tanh %113 : vector<8x64xf32>
      %c0_100 = arith.constant 0 : index
      %c0_101 = arith.constant 0 : index
      %115 = vector.load %arg15[%c0_100, %c0_101] : memref<32x16xf32, #tpu.memory_space<vmem>>, vector<32x16xf32>
      %cst_102 = arith.constant dense<0.000000e+00> : vector<8x16xf32>
      %116 = tpu.matmul %92, %115, %cst_102 {dimension_numbers = #tpu.dot_dimension_numbers<[1], [0], [0], [1], [0, 0, 1, 1], [], []>} : vector<8x32xf32>, vector<32x16xf32>, vector<8x16xf32> -> vector<8x16xf32>
      %c0_103 = arith.constant 0 : index
      %c0_104 = arith.constant 0 : index
      %117 = vector.load %arg16[%c0_103, %c0_104] : memref<48x16xf32, #tpu.memory_space<vmem>>, vector<48x16xf32>
      %cst_105 = arith.constant dense<0.000000e+00> : vector<8x16xf32>
      %118 = tpu.matmul %103, %117, %cst_105 {dimension_numbers = #tpu.dot_dimension_numbers<[1], [0], [0], [1], [0, 0, 1, 1], [], []>} : vector<8x48xf32>, vector<48x16xf32>, vector<8x16xf32> -> vector<8x16xf32>
      %119 = arith.addf %116, %118 : vector<8x16xf32>
      %c0_106 = arith.constant 0 : index
      %c0_107 = arith.constant 0 : index
      %120 = vector.load %arg17[%c0_106, %c0_107] : memref<64x16xf32, #tpu.memory_space<vmem>>, vector<64x16xf32>
      %cst_108 = arith.constant dense<0.000000e+00> : vector<8x16xf32>
      %121 = tpu.matmul %114, %120, %cst_108 {dimension_numbers = #tpu.dot_dimension_numbers<[1], [0], [0], [1], [0, 0, 1, 1], [], []>} : vector<8x64xf32>, vector<64x16xf32>, vector<8x16xf32> -> vector<8x16xf32>
      %122 = arith.addf %119, %121 : vector<8x16xf32>
      %cst_109 = arith.constant 0.949999988 : f32
      %123 = vector.broadcast %cst_109 : f32 to vector<8x16xf32>
      %124 = arith.mulf %123, %73 : vector<8x16xf32>
      %cst_110 = arith.constant 5.000000e-02 : f32
      %125 = vector.broadcast %cst_110 : f32 to vector<8x16xf32>
      %126 = arith.mulf %125, %122 : vector<8x16xf32>
      %127 = arith.addf %124, %126 : vector<8x16xf32>
      %128 = math.tanh %127 : vector<8x16xf32>
      %129 = arith.index_cast %80 : i32 to index
      %c0_111 = arith.constant 0 : index
      %c0_112 = arith.constant 0 : index
      %130 = vector.load %arg18[%129, %c0_111, %c0_112] : memref<32x8x16xf32, #tpu.memory_space<vmem>>, vector<1x8x16xf32>
      %131 = vector.shape_cast %130 : vector<1x8x16xf32> to vector<8x16xf32>
      %132 = vector.shape_cast %128 : vector<8x16xf32> to vector<1x8x16xf32>
      tpu.vector_store %arg18[%129, %c0_111, %c0_112], %132 {strides = array<i32>} : memref<32x8x16xf32, #tpu.memory_space<vmem>>, vector<1x8x16xf32>,
      %c4_i32_113 = arith.constant 4 : i32
      %133 = arith.muli %arg27, %c4_i32_113 : i32
      %c2_i32 = arith.constant 2 : i32
      %134 = arith.addi %133, %c2_i32 : i32
      %135 = arith.index_cast %134 : i32 to index
      %c0_114 = arith.constant 0 : index
      %c0_115 = arith.constant 0 : index
      %136 = vector.load %arg26[%135, %c0_114, %c0_115] : memref<32x8x32xf32, #tpu.memory_space<vmem>>, vector<1x8x32xf32>
      %137 = vector.shape_cast %136 : vector<1x8x32xf32> to vector<8x32xf32>
      %c0_116 = arith.constant 0 : index
      %c0_117 = arith.constant 0 : index
      %138 = vector.load %arg10[%c0_116, %c0_117] : memref<32x32xf32, #tpu.memory_space<vmem>>, vector<32x32xf32>
      %cst_118 = arith.constant dense<0.000000e+00> : vector<8x32xf32>
      %139 = tpu.matmul %92, %138, %cst_118 {dimension_numbers = #tpu.dot_dimension_numbers<[1], [0], [0], [1], [0, 0, 1, 1], [], []>} : vector<8x32xf32>, vector<32x32xf32>, vector<8x32xf32> -> vector<8x32xf32>
      %140 = arith.addf %137, %139 : vector<8x32xf32>
      %cst_119 = arith.constant 0.899999976 : f32
      %141 = vector.broadcast %cst_119 : f32 to vector<8x32xf32>
      %142 = arith.mulf %141, %91 : vector<8x32xf32>
      %cst_120 = arith.constant 1.000000e-01 : f32
      %143 = vector.broadcast %cst_120 : f32 to vector<8x32xf32>
      %144 = arith.mulf %143, %140 : vector<8x32xf32>
      %145 = arith.addf %142, %144 : vector<8x32xf32>
      %146 = math.tanh %145 : vector<8x32xf32>
      %c0_121 = arith.constant 0 : index
      %c0_122 = arith.constant 0 : index
      %147 = vector.load %arg11[%c0_121, %c0_122] : memref<32x48xf32, #tpu.memory_space<vmem>>, vector<32x48xf32>
      %cst_123 = arith.constant dense<0.000000e+00> : vector<8x48xf32>
      %148 = tpu.matmul %146, %147, %cst_123 {dimension_numbers = #tpu.dot_dimension_numbers<[1], [0], [0], [1], [0, 0, 1, 1], [], []>} : vector<8x32xf32>, vector<32x48xf32>, vector<8x48xf32> -> vector<8x48xf32>
      %c0_124 = arith.constant 0 : index
      %c0_125 = arith.constant 0 : index
      %149 = vector.load %arg12[%c0_124, %c0_125] : memref<48x48xf32, #tpu.memory_space<vmem>>, vector<48x48xf32>
      %cst_126 = arith.constant dense<0.000000e+00> : vector<8x48xf32>
      %150 = tpu.matmul %103, %149, %cst_126 {dimension_numbers = #tpu.dot_dimension_numbers<[1], [0], [0], [1], [0, 0, 1, 1], [], []>} : vector<8x48xf32>, vector<48x48xf32>, vector<8x48xf32> -> vector<8x48xf32>
      %151 = arith.addf %148, %150 : vector<8x48xf32>
      %cst_127 = arith.constant 8.750000e-01 : f32
      %152 = vector.broadcast %cst_127 : f32 to vector<8x48xf32>
      %153 = arith.mulf %152, %102 : vector<8x48xf32>
      %cst_128 = arith.constant 1.250000e-01 : f32
      %154 = vector.broadcast %cst_128 : f32 to vector<8x48xf32>
      %155 = arith.mulf %154, %151 : vector<8x48xf32>
      %156 = arith.addf %153, %155 : vector<8x48xf32>
      %157 = math.tanh %156 : vector<8x48xf32>
      %c0_129 = arith.constant 0 : index
      %c0_130 = arith.constant 0 : index
      %158 = vector.load %arg13[%c0_129, %c0_130] : memref<48x64xf32, #tpu.memory_space<vmem>>, vector<48x64xf32>
      %cst_131 = arith.constant dense<0.000000e+00> : vector<8x64xf32>
      %159 = tpu.matmul %157, %158, %cst_131 {dimension_numbers = #tpu.dot_dimension_numbers<[1], [0], [0], [1], [0, 0, 1, 1], [], []>} : vector<8x48xf32>, vector<48x64xf32>, vector<8x64xf32> -> vector<8x64xf32>
      %c0_132 = arith.constant 0 : index
      %c0_133 = arith.constant 0 : index
      %160 = vector.load %arg14[%c0_132, %c0_133] : memref<64x64xf32, #tpu.memory_space<vmem>>, vector<64x64xf32>
      %cst_134 = arith.constant dense<0.000000e+00> : vector<8x64xf32>
      %161 = tpu.matmul %114, %160, %cst_134 {dimension_numbers = #tpu.dot_dimension_numbers<[1], [0], [0], [1], [0, 0, 1, 1], [], []>} : vector<8x64xf32>, vector<64x64xf32>, vector<8x64xf32> -> vector<8x64xf32>
      %162 = arith.addf %159, %161 : vector<8x64xf32>
      %cst_135 = arith.constant 0.833333313 : f32
      %163 = vector.broadcast %cst_135 : f32 to vector<8x64xf32>
      %164 = arith.mulf %163, %113 : vector<8x64xf32>
      %cst_136 = arith.constant 0.166666672 : f32
      %165 = vector.broadcast %cst_136 : f32 to vector<8x64xf32>
      %166 = arith.mulf %165, %162 : vector<8x64xf32>
      %167 = arith.addf %164, %166 : vector<8x64xf32>
      %168 = math.tanh %167 : vector<8x64xf32>
      %c0_137 = arith.constant 0 : index
      %c0_138 = arith.constant 0 : index
      %169 = vector.load %arg15[%c0_137, %c0_138] : memref<32x16xf32, #tpu.memory_space<vmem>>, vector<32x16xf32>
      %cst_139 = arith.constant dense<0.000000e+00> : vector<8x16xf32>
      %170 = tpu.matmul %146, %169, %cst_139 {dimension_numbers = #tpu.dot_dimension_numbers<[1], [0], [0], [1], [0, 0, 1, 1], [], []>} : vector<8x32xf32>, vector<32x16xf32>, vector<8x16xf32> -> vector<8x16xf32>
      %c0_140 = arith.constant 0 : index
      %c0_141 = arith.constant 0 : index
      %171 = vector.load %arg16[%c0_140, %c0_141] : memref<48x16xf32, #tpu.memory_space<vmem>>, vector<48x16xf32>
      %cst_142 = arith.constant dense<0.000000e+00> : vector<8x16xf32>
      %172 = tpu.matmul %157, %171, %cst_142 {dimension_numbers = #tpu.dot_dimension_numbers<[1], [0], [0], [1], [0, 0, 1, 1], [], []>} : vector<8x48xf32>, vector<48x16xf32>, vector<8x16xf32> -> vector<8x16xf32>
      %173 = arith.addf %170, %172 : vector<8x16xf32>
      %c0_143 = arith.constant 0 : index
      %c0_144 = arith.constant 0 : index
      %174 = vector.load %arg17[%c0_143, %c0_144] : memref<64x16xf32, #tpu.memory_space<vmem>>, vector<64x16xf32>
      %cst_145 = arith.constant dense<0.000000e+00> : vector<8x16xf32>
      %175 = tpu.matmul %168, %174, %cst_145 {dimension_numbers = #tpu.dot_dimension_numbers<[1], [0], [0], [1], [0, 0, 1, 1], [], []>} : vector<8x64xf32>, vector<64x16xf32>, vector<8x16xf32> -> vector<8x16xf32>
      %176 = arith.addf %173, %175 : vector<8x16xf32>
      %cst_146 = arith.constant 0.949999988 : f32
      %177 = vector.broadcast %cst_146 : f32 to vector<8x16xf32>
      %178 = arith.mulf %177, %127 : vector<8x16xf32>
      %cst_147 = arith.constant 5.000000e-02 : f32
      %179 = vector.broadcast %cst_147 : f32 to vector<8x16xf32>
      %180 = arith.mulf %179, %176 : vector<8x16xf32>
      %181 = arith.addf %178, %180 : vector<8x16xf32>
      %182 = math.tanh %181 : vector<8x16xf32>
      %183 = arith.index_cast %134 : i32 to index
      %c0_148 = arith.constant 0 : index
      %c0_149 = arith.constant 0 : index
      %184 = vector.load %arg18[%183, %c0_148, %c0_149] : memref<32x8x16xf32, #tpu.memory_space<vmem>>, vector<1x8x16xf32>
      %185 = vector.shape_cast %184 : vector<1x8x16xf32> to vector<8x16xf32>
      %186 = vector.shape_cast %182 : vector<8x16xf32> to vector<1x8x16xf32>
      tpu.vector_store %arg18[%183, %c0_148, %c0_149], %186 {strides = array<i32>} : memref<32x8x16xf32, #tpu.memory_space<vmem>>, vector<1x8x16xf32>,
      %c4_i32_150 = arith.constant 4 : i32
      %187 = arith.muli %arg27, %c4_i32_150 : i32
      %c3_i32 = arith.constant 3 : i32
      %188 = arith.addi %187, %c3_i32 : i32
      %189 = arith.index_cast %188 : i32 to index
      %c0_151 = arith.constant 0 : index
      %c0_152 = arith.constant 0 : index
      %190 = vector.load %arg26[%189, %c0_151, %c0_152] : memref<32x8x32xf32, #tpu.memory_space<vmem>>, vector<1x8x32xf32>
      %191 = vector.shape_cast %190 : vector<1x8x32xf32> to vector<8x32xf32>
      %c0_153 = arith.constant 0 : index
      %c0_154 = arith.constant 0 : index
      %192 = vector.load %arg10[%c0_153, %c0_154] : memref<32x32xf32, #tpu.memory_space<vmem>>, vector<32x32xf32>
      %cst_155 = arith.constant dense<0.000000e+00> : vector<8x32xf32>
      %193 = tpu.matmul %146, %192, %cst_155 {dimension_numbers = #tpu.dot_dimension_numbers<[1], [0], [0], [1], [0, 0, 1, 1], [], []>} : vector<8x32xf32>, vector<32x32xf32>, vector<8x32xf32> -> vector<8x32xf32>
      %194 = arith.addf %191, %193 : vector<8x32xf32>
      %cst_156 = arith.constant 0.899999976 : f32
      %195 = vector.broadcast %cst_156 : f32 to vector<8x32xf32>
      %196 = arith.mulf %195, %145 : vector<8x32xf32>
      %cst_157 = arith.constant 1.000000e-01 : f32
      %197 = vector.broadcast %cst_157 : f32 to vector<8x32xf32>
      %198 = arith.mulf %197, %194 : vector<8x32xf32>
      %199 = arith.addf %196, %198 : vector<8x32xf32>
      %200 = math.tanh %199 : vector<8x32xf32>
      %c0_158 = arith.constant 0 : index
      %c0_159 = arith.constant 0 : index
      %201 = vector.load %arg11[%c0_158, %c0_159] : memref<32x48xf32, #tpu.memory_space<vmem>>, vector<32x48xf32>
      %cst_160 = arith.constant dense<0.000000e+00> : vector<8x48xf32>
      %202 = tpu.matmul %200, %201, %cst_160 {dimension_numbers = #tpu.dot_dimension_numbers<[1], [0], [0], [1], [0, 0, 1, 1], [], []>} : vector<8x32xf32>, vector<32x48xf32>, vector<8x48xf32> -> vector<8x48xf32>
      %c0_161 = arith.constant 0 : index
      %c0_162 = arith.constant 0 : index
      %203 = vector.load %arg12[%c0_161, %c0_162] : memref<48x48xf32, #tpu.memory_space<vmem>>, vector<48x48xf32>
      %cst_163 = arith.constant dense<0.000000e+00> : vector<8x48xf32>
      %204 = tpu.matmul %157, %203, %cst_163 {dimension_numbers = #tpu.dot_dimension_numbers<[1], [0], [0], [1], [0, 0, 1, 1], [], []>} : vector<8x48xf32>, vector<48x48xf32>, vector<8x48xf32> -> vector<8x48xf32>
      %205 = arith.addf %202, %204 : vector<8x48xf32>
      %cst_164 = arith.constant 8.750000e-01 : f32
      %206 = vector.broadcast %cst_164 : f32 to vector<8x48xf32>
      %207 = arith.mulf %206, %156 : vector<8x48xf32>
      %cst_165 = arith.constant 1.250000e-01 : f32
      %208 = vector.broadcast %cst_165 : f32 to vector<8x48xf32>
      %209 = arith.mulf %208, %205 : vector<8x48xf32>
      %210 = arith.addf %207, %209 : vector<8x48xf32>
      %211 = math.tanh %210 : vector<8x48xf32>
      %c0_166 = arith.constant 0 : index
      %c0_167 = arith.constant 0 : index
      %212 = vector.load %arg13[%c0_166, %c0_167] : memref<48x64xf32, #tpu.memory_space<vmem>>, vector<48x64xf32>
      %cst_168 = arith.constant dense<0.000000e+00> : vector<8x64xf32>
      %213 = tpu.matmul %211, %212, %cst_168 {dimension_numbers = #tpu.dot_dimension_numbers<[1], [0], [0], [1], [0, 0, 1, 1], [], []>} : vector<8x48xf32>, vector<48x64xf32>, vector<8x64xf32> -> vector<8x64xf32>
      %c0_169 = arith.constant 0 : index
      %c0_170 = arith.constant 0 : index
      %214 = vector.load %arg14[%c0_169, %c0_170] : memref<64x64xf32, #tpu.memory_space<vmem>>, vector<64x64xf32>
      %cst_171 = arith.constant dense<0.000000e+00> : vector<8x64xf32>
      %215 = tpu.matmul %168, %214, %cst_171 {dimension_numbers = #tpu.dot_dimension_numbers<[1], [0], [0], [1], [0, 0, 1, 1], [], []>} : vector<8x64xf32>, vector<64x64xf32>, vector<8x64xf32> -> vector<8x64xf32>
      %216 = arith.addf %213, %215 : vector<8x64xf32>
      %cst_172 = arith.constant 0.833333313 : f32
      %217 = vector.broadcast %cst_172 : f32 to vector<8x64xf32>
      %218 = arith.mulf %217, %167 : vector<8x64xf32>
      %cst_173 = arith.constant 0.166666672 : f32
      %219 = vector.broadcast %cst_173 : f32 to vector<8x64xf32>
      %220 = arith.mulf %219, %216 : vector<8x64xf32>
      %221 = arith.addf %218, %220 : vector<8x64xf32>
      %222 = math.tanh %221 : vector<8x64xf32>
      %c0_174 = arith.constant 0 : index
      %c0_175 = arith.constant 0 : index
      %223 = vector.load %arg15[%c0_174, %c0_175] : memref<32x16xf32, #tpu.memory_space<vmem>>, vector<32x16xf32>
      %cst_176 = arith.constant dense<0.000000e+00> : vector<8x16xf32>
      %224 = tpu.matmul %200, %223, %cst_176 {dimension_numbers = #tpu.dot_dimension_numbers<[1], [0], [0], [1], [0, 0, 1, 1], [], []>} : vector<8x32xf32>, vector<32x16xf32>, vector<8x16xf32> -> vector<8x16xf32>
      %c0_177 = arith.constant 0 : index
      %c0_178 = arith.constant 0 : index
      %225 = vector.load %arg16[%c0_177, %c0_178] : memref<48x16xf32, #tpu.memory_space<vmem>>, vector<48x16xf32>
      %cst_179 = arith.constant dense<0.000000e+00> : vector<8x16xf32>
      %226 = tpu.matmul %211, %225, %cst_179 {dimension_numbers = #tpu.dot_dimension_numbers<[1], [0], [0], [1], [0, 0, 1, 1], [], []>} : vector<8x48xf32>, vector<48x16xf32>, vector<8x16xf32> -> vector<8x16xf32>
      %227 = arith.addf %224, %226 : vector<8x16xf32>
      %c0_180 = arith.constant 0 : index
      %c0_181 = arith.constant 0 : index
      %228 = vector.load %arg17[%c0_180, %c0_181] : memref<64x16xf32, #tpu.memory_space<vmem>>, vector<64x16xf32>
      %cst_182 = arith.constant dense<0.000000e+00> : vector<8x16xf32>
      %229 = tpu.matmul %222, %228, %cst_182 {dimension_numbers = #tpu.dot_dimension_numbers<[1], [0], [0], [1], [0, 0, 1, 1], [], []>} : vector<8x64xf32>, vector<64x16xf32>, vector<8x16xf32> -> vector<8x16xf32>
      %230 = arith.addf %227, %229 : vector<8x16xf32>
      %cst_183 = arith.constant 0.949999988 : f32
      %231 = vector.broadcast %cst_183 : f32 to vector<8x16xf32>
      %232 = arith.mulf %231, %181 : vector<8x16xf32>
      %cst_184 = arith.constant 5.000000e-02 : f32
      %233 = vector.broadcast %cst_184 : f32 to vector<8x16xf32>
      %234 = arith.mulf %233, %230 : vector<8x16xf32>
      %235 = arith.addf %232, %234 : vector<8x16xf32>
      %236 = math.tanh %235 : vector<8x16xf32>
      %237 = arith.index_cast %188 : i32 to index
      %c0_185 = arith.constant 0 : index
      %c0_186 = arith.constant 0 : index
      %238 = vector.load %arg18[%237, %c0_185, %c0_186] : memref<32x8x16xf32, #tpu.memory_space<vmem>>, vector<1x8x16xf32>
      %239 = vector.shape_cast %238 : vector<1x8x16xf32> to vector<8x16xf32>
      %240 = vector.shape_cast %236 : vector<8x16xf32> to vector<1x8x16xf32>
      tpu.vector_store %arg18[%237, %c0_185, %c0_186], %240 {strides = array<i32>} : memref<32x8x16xf32, #tpu.memory_space<vmem>>, vector<1x8x16xf32>,
      scf.yield %199, %200, %210, %211, %221, %222, %235 : vector<8x32xf32>, vector<8x32xf32>, vector<8x48xf32>, vector<8x48xf32>, vector<8x64xf32>, vector<8x64xf32>, vector<8x16xf32>
    }
    %c8_i32_23 = arith.constant 8 : i32
    %c0_24 = arith.constant 0 : index
    %c0_25 = arith.constant 0 : index
    %18 = vector.load %arg19[%c0_24, %c0_25] : memref<8x32xf32, #tpu.memory_space<vmem>>, vector<8x32xf32>
    tpu.vector_store %arg19[%c0_24, %c0_25], %17#0 {strides = array<i32>} : memref<8x32xf32, #tpu.memory_space<vmem>>, vector<8x32xf32>,
    %c0_26 = arith.constant 0 : index
    %c0_27 = arith.constant 0 : index
    %19 = vector.load %arg20[%c0_26, %c0_27] : memref<8x32xf32, #tpu.memory_space<vmem>>, vector<8x32xf32>
    tpu.vector_store %arg20[%c0_26, %c0_27], %17#1 {strides = array<i32>} : memref<8x32xf32, #tpu.memory_space<vmem>>, vector<8x32xf32>,
    %c0_28 = arith.constant 0 : index
    %c0_29 = arith.constant 0 : index
    %20 = vector.load %arg21[%c0_28, %c0_29] : memref<8x48xf32, #tpu.memory_space<vmem>>, vector<8x48xf32>
    tpu.vector_store %arg21[%c0_28, %c0_29], %17#2 {strides = array<i32>} : memref<8x48xf32, #tpu.memory_space<vmem>>, vector<8x48xf32>,
    %c0_30 = arith.constant 0 : index
    %c0_31 = arith.constant 0 : index
    %21 = vector.load %arg22[%c0_30, %c0_31] : memref<8x48xf32, #tpu.memory_space<vmem>>, vector<8x48xf32>
    tpu.vector_store %arg22[%c0_30, %c0_31], %17#3 {strides = array<i32>} : memref<8x48xf32, #tpu.memory_space<vmem>>, vector<8x48xf32>,
    %c0_32 = arith.constant 0 : index
    %c0_33 = arith.constant 0 : index
    %22 = vector.load %arg23[%c0_32, %c0_33] : memref<8x64xf32, #tpu.memory_space<vmem>>, vector<8x64xf32>
    tpu.vector_store %arg23[%c0_32, %c0_33], %17#4 {strides = array<i32>} : memref<8x64xf32, #tpu.memory_space<vmem>>, vector<8x64xf32>,
    %c0_34 = arith.constant 0 : index
    %c0_35 = arith.constant 0 : index
    %23 = vector.load %arg24[%c0_34, %c0_35] : memref<8x64xf32, #tpu.memory_space<vmem>>, vector<8x64xf32>
    tpu.vector_store %arg24[%c0_34, %c0_35], %17#5 {strides = array<i32>} : memref<8x64xf32, #tpu.memory_space<vmem>>, vector<8x64xf32>,
    %c0_36 = arith.constant 0 : index
    %c0_37 = arith.constant 0 : index
    %24 = vector.load %arg25[%c0_36, %c0_37] : memref<8x16xf32, #tpu.memory_space<vmem>>, vector<8x16xf32>
    tpu.vector_store %arg25[%c0_36, %c0_37], %17#6 {strides = array<i32>} : memref<8x16xf32, #tpu.memory_space<vmem>>, vector<8x16xf32>,
    return
  }
  func.func @transform_0(%arg0: i32) -> (i32, i32, i32) {
    %c0_i32 = arith.constant 0 : i32
    %c0_i32_0 = arith.constant 0 : i32
    %c0_i32_1 = arith.constant 0 : i32
    return %arg0, %c0_i32, %c0_i32_0 : i32, i32, i32
  }
  func.func @transform_1(%arg0: i32) -> (i32, i32) {
    %c0_i32 = arith.constant 0 : i32
    %c0_i32_0 = arith.constant 0 : i32
    %c0_i32_1 = arith.constant 0 : i32
    return %c0_i32, %c0_i32_0 : i32, i32
  }
  func.func @transform_2(%arg0: i32) -> (i32, i32) {
    %c0_i32 = arith.constant 0 : i32
    %c0_i32_0 = arith.constant 0 : i32
    %c0_i32_1 = arith.constant 0 : i32
    return %c0_i32, %c0_i32_0 : i32, i32
  }
  func.func @transform_3(%arg0: i32) -> (i32, i32) {
    %c0_i32 = arith.constant 0 : i32
    %c0_i32_0 = arith.constant 0 : i32
    %c0_i32_1 = arith.constant 0 : i32
    return %c0_i32, %c0_i32_0 : i32, i32
  }
  func.func @transform_4(%arg0: i32) -> (i32, i32) {
    %c0_i32 = arith.constant 0 : i32
    %c0_i32_0 = arith.constant 0 : i32
    %c0_i32_1 = arith.constant 0 : i32
    return %c0_i32, %c0_i32_0 : i32, i32
  }
  func.func @transform_5(%arg0: i32) -> (i32, i32) {
    %c0_i32 = arith.constant 0 : i32
    %c0_i32_0 = arith.constant 0 : i32
    %c0_i32_1 = arith.constant 0 : i32
    return %c0_i32, %c0_i32_0 : i32, i32
  }
  func.func @transform_6(%arg0: i32) -> (i32, i32) {
    %c0_i32 = arith.constant 0 : i32
    %c0_i32_0 = arith.constant 0 : i32
    %c0_i32_1 = arith.constant 0 : i32
    return %c0_i32, %c0_i32_0 : i32, i32
  }
  func.func @transform_7(%arg0: i32) -> (i32, i32) {
    %c0_i32 = arith.constant 0 : i32
    %c0_i32_0 = arith.constant 0 : i32
    %c0_i32_1 = arith.constant 0 : i32
    return %c0_i32, %c0_i32_0 : i32, i32
  }
  func.func @transform_8(%arg0: i32) -> (i32, i32) {
    %c0_i32 = arith.constant 0 : i32
    %c0_i32_0 = arith.constant 0 : i32
    %c0_i32_1 = arith.constant 0 : i32
    return %c0_i32, %c0_i32_0 : i32, i32
  }
  func.func @transform_9(%arg0: i32) -> (i32, i32) {
    %c0_i32 = arith.constant 0 : i32
    %c0_i32_0 = arith.constant 0 : i32
    %c0_i32_1 = arith.constant 0 : i32
    return %c0_i32, %c0_i32_0 : i32, i32
  }
  func.func @transform_10(%arg0: i32) -> (i32, i32) {
    %c0_i32 = arith.constant 0 : i32
    %c0_i32_0 = arith.constant 0 : i32
    %c0_i32_1 = arith.constant 0 : i32
    return %c0_i32, %c0_i32_0 : i32, i32
  }
  func.func @transform_11(%arg0: i32) -> (i32, i32) {
    %c0_i32 = arith.constant 0 : i32
    %c0_i32_0 = arith.constant 0 : i32
    %c0_i32_1 = arith.constant 0 : i32
    return %c0_i32, %c0_i32_0 : i32, i32
  }
  func.func @transform_12(%arg0: i32) -> (i32, i32) {
    %c0_i32 = arith.constant 0 : i32
    %c0_i32_0 = arith.constant 0 : i32
    %c0_i32_1 = arith.constant 0 : i32
    return %c0_i32, %c0_i32_0 : i32, i32
  }
  func.func @transform_13(%arg0: i32) -> (i32, i32) {
    %c0_i32 = arith.constant 0 : i32
    %c0_i32_0 = arith.constant 0 : i32
    %c0_i32_1 = arith.constant 0 : i32
    return %c0_i32, %c0_i32_0 : i32, i32
  }
  func.func @transform_14(%arg0: i32) -> (i32, i32) {
    %c0_i32 = arith.constant 0 : i32
    %c0_i32_0 = arith.constant 0 : i32
    %c0_i32_1 = arith.constant 0 : i32
    return %c0_i32, %c0_i32_0 : i32, i32
  }
  func.func @transform_15(%arg0: i32) -> (i32, i32) {
    %c0_i32 = arith.constant 0 : i32
    %c0_i32_0 = arith.constant 0 : i32
    %c0_i32_1 = arith.constant 0 : i32
    return %c0_i32, %c0_i32_0 : i32, i32
  }
  func.func @transform_16(%arg0: i32) -> (i32, i32) {
    %c0_i32 = arith.constant 0 : i32
    %c0_i32_0 = arith.constant 0 : i32
    %c0_i32_1 = arith.constant 0 : i32
    return %c0_i32, %c0_i32_0 : i32, i32
  }
  func.func @transform_17(%arg0: i32) -> (i32, i32, i32) {
    %c0_i32 = arith.constant 0 : i32
    %c0_i32_0 = arith.constant 0 : i32
    %c0_i32_1 = arith.constant 0 : i32
    return %arg0, %c0_i32, %c0_i32_0 : i32, i32, i32
  }
  func.func @transform_18(%arg0: i32) -> (i32, i32) {
    %c0_i32 = arith.constant 0 : i32
    %c0_i32_0 = arith.constant 0 : i32
    %c0_i32_1 = arith.constant 0 : i32
    return %c0_i32, %c0_i32_0 : i32, i32
  }
  func.func @transform_19(%arg0: i32) -> (i32, i32) {
    %c0_i32 = arith.constant 0 : i32
    %c0_i32_0 = arith.constant 0 : i32
    %c0_i32_1 = arith.constant 0 : i32
    return %c0_i32, %c0_i32_0 : i32, i32
  }
  func.func @transform_20(%arg0: i32) -> (i32, i32) {
    %c0_i32 = arith.constant 0 : i32
    %c0_i32_0 = arith.constant 0 : i32
    %c0_i32_1 = arith.constant 0 : i32
    return %c0_i32, %c0_i32_0 : i32, i32
  }
  func.func @transform_21(%arg0: i32) -> (i32, i32) {
    %c0_i32 = arith.constant 0 : i32
    %c0_i32_0 = arith.constant 0 : i32
    %c0_i32_1 = arith.constant 0 : i32
    return %c0_i32, %c0_i32_0 : i32, i32
  }
  func.func @transform_22(%arg0: i32) -> (i32, i32) {
    %c0_i32 = arith.constant 0 : i32
    %c0_i32_0 = arith.constant 0 : i32
    %c0_i32_1 = arith.constant 0 : i32
    return %c0_i32, %c0_i32_0 : i32, i32
  }
  func.func @transform_23(%arg0: i32) -> (i32, i32) {
    %c0_i32 = arith.constant 0 : i32
    %c0_i32_0 = arith.constant 0 : i32
    %c0_i32_1 = arith.constant 0 : i32
    return %c0_i32, %c0_i32_0 : i32, i32
  }
  func.func @transform_24(%arg0: i32) -> (i32, i32) {
    %c0_i32 = arith.constant 0 : i32
    %c0_i32_0 = arith.constant 0 : i32
    %c0_i32_1 = arith.constant 0 : i32
    return %c0_i32, %c0_i32_0 : i32, i32
  }
}

</mosaic_0001>

<bundles_post_ra>
// kernel: dm_echo3_forward_seq.1
= control target key start
LH: loop header
LB: loop body
LE: loop exit
PB: predicated region body
PF: predicated region fallthrough
CT: control target
= control target key end

     0   :  { %vm74_vm0 = vcmask 392192   ;;  %vm79_vm1 = vcmask 523264   ;;  %vm84_vm2 = vcmask 130048   ;;  %vm69_vm3 = vcmask 261120   ;;  %s5501_s1 = inlined_call_operand.vmem [shape: f32[8,32], index: 1, kind: input, shape index: {}, may-alias: {1,18}]   ;;  %s5502_s2 = inlined_call_operand.vmem [shape: f32[8,32], index: 2, kind: input, shape index: {}, may-alias: {2,19}]   ;;  %s5503_s3 = inlined_call_operand.vmem [shape: f32[8,48], index: 3, kind: input, shape index: {}, may-alias: {3,20}]   ;;  %s5504_s4 = inlined_call_operand.vmem [shape: f32[8,48], index: 4, kind: input, shape index: {}, may-alias: {4,21}]   ;;  %s5505_s5 = inlined_call_operand.vmem [shape: f32[8,64], index: 5, kind: input, shape index: {}, may-alias: {5,22}]   ;;  %s5506_s6 = inlined_call_operand.vmem [shape: f32[8,64], index: 6, kind: input, shape index: {}, may-alias: {6,23}]   ;;  %s5507_s7 = inlined_call_operand.vmem [shape: f32[8,16], index: 7, kind: input, shape index: {}, may-alias: {7,24}]   ;;  %s5508_s8 = inlined_call_operand.vmem [shape: f32[8,32], index: 8, kind: input, shape index: {}]   ;;  %s5509_s9 = inlined_call_operand.vmem [shape: f32[32,32], index: 9, kind: input, shape index: {}]   ;;  %s5510_s10 = inlined_call_operand.vmem [shape: f32[32,48], index: 10, kind: input, shape index: {}]   ;;  %s5511_s11 = inlined_call_operand.vmem [shape: f32[48,48], index: 11, kind: input, shape index: {}]   ;;  %s5512_s12 = inlined_call_operand.vmem [shape: f32[48,64], index: 12, kind: input, shape index: {}]   ;;  %s5513_s13 = inlined_call_operand.vmem [shape: f32[64,64], index: 13, kind: input, shape index: {}]   ;;  %s5514_s14 = inlined_call_operand.vmem [shape: f32[32,16], index: 14, kind: input, shape index: {}]   ;;  %s5515_s15 = inlined_call_operand.vmem [shape: f32[48,16], index: 15, kind: input, shape index: {}]   ;;  %s5516_s16 = inlined_call_operand.vmem [shape: f32[64,16], index: 16, kind: input, shape index: {}]   ;;  %s5517_s17 = inlined_call_operand.vmem [shape: f32[32,8,16], index: 17, kind: output, shape index: {0}]   ;;  %s5518_s18 = inlined_call_operand.vmem [shape: f32[8,32], index: 18, kind: output, shape index: {1}, may-alias: {1,18}]   ;;  %s5519_s19 = inlined_call_operand.vmem [shape: f32[8,32], index: 19, kind: output, shape index: {2}, may-alias: {2,19}]   ;;  %s5520_s20 = inlined_call_operand.vmem [shape: f32[8,48], index: 20, kind: output, shape index: {3}, may-alias: {3,20}]   ;;  %s5521_s21 = inlined_call_operand.vmem [shape: f32[8,48], index: 21, kind: output, shape index: {4}, may-alias: {4,21}]   ;;  %s5522_s22 = inlined_call_operand.vmem [shape: f32[8,64], index: 22, kind: output, shape index: {5}, may-alias: {5,22}]   ;;  %s5523_s23 = inlined_call_operand.vmem [shape: f32[8,64], index: 23, kind: output, shape index: {6}, may-alias: {6,23}]   ;;  %s5524_s0 = inlined_call_operand.vmem [shape: f32[32,8,8], index: 0, kind: input, shape index: {}]   ;;  %s5525_s24 = inlined_call_operand.vmem [shape: f32[8,16], index: 24, kind: output, shape index: {7}, may-alias: {7,24}]  }
   0x1   :  { %5527 = sst [smem:[#allocation3_spill]] %s5501_s1  ;;  %v86_v8 = vld [vmem:[%s5524_s0] sm:$0xff]  ;;  %vm119_vm4 = vcmask 64512   ;;  %v87_v10 = vld [vmem:[%s5524_s0 + $0x8] sm:$0xff]  ;;  %v88_v12 = vld [vmem:[%s5524_s0 + $0x10] sm:$0xff] }
   0x2   :  { %5528 = sst [smem:[#allocation4_spill]] %s5502_s2  ;;  %s5536_s27 = sld [smem:[#allocation3_spill]]  ;;  %v102_v9 = vld [vmem:[%s5524_s0 + $0x80] sm:$0xff]  ;;  %v103_v11 = vld [vmem:[%s5524_s0 + $0x88] sm:$0xff]  ;;  %v104_v13 = vld [vmem:[%s5524_s0 + $0x90] sm:$0xff]  ;;  %3500 = vmatprep.mubr.msk.f32.mxu0 %vm119_vm4, %v86_v8 }
   0x3   :  { %5529 = sst [smem:[#allocation5_spill]] %s5503_s3  ;;  %s5537_s3 = sld [smem:[#allocation4_spill]]  ;;  %3524 = vmatprep.mubr.msk.f32.mxu1 %vm119_vm4, %v102_v9  ;;  %v89_v14 = vld [vmem:[%s5524_s0 + $0x18] sm:$0xff]  ;;  %v90_v16 = vld [vmem:[%s5524_s0 + $0x20] sm:$0xff]  ;;  %v91_v18 = vld [vmem:[%s5524_s0 + $0x28] sm:$0xff] }
   0x4   :  { %5530 = sst [smem:[#allocation6_spill]] %s5504_s4  ;;  %v105_v15 = vld [vmem:[%s5524_s0 + $0x98] sm:$0xff]  ;;  %v106_v17 = vld [vmem:[%s5524_s0 + $0xa0] sm:$0xff]  ;;  %v107_v19 = vld [vmem:[%s5524_s0 + $0xa8] sm:$0xff]  ;;  %s4881_s4 = smov 0  }
   0x5   :  { %5531 = sst [smem:[#allocation7_spill]] %s5505_s5  ;;  %s5539_s5 = sld [smem:[#allocation6_spill]]  ;;  %v92_v20 = vld [vmem:[%s5524_s0 + $0x30] sm:$0xff]  ;;  %v93_v22 = vld [vmem:[%s5524_s0 + $0x38] sm:$0xff]  ;;  %v94_v24 = vld [vmem:[%s5524_s0 + $0x40] sm:$0xff] }
   0x6   :  { %5532 = sst [smem:[#allocation8_spill]] %s5506_s6  ;;  %s5540_s26 = sld [smem:[#allocation7_spill]]  ;;  %v108_v21 = vld [vmem:[%s5524_s0 + $0xb0] sm:$0xff]  ;;  %v109_v23 = vld [vmem:[%s5524_s0 + $0xb8] sm:$0xff]  ;;  %v110_v25 = vld [vmem:[%s5524_s0 + $0xc0] sm:$0xff] }
   0x7   :  { %5533 = sst [smem:[#allocation9_spill]] %s5507_s7  ;;  %s5541_s7 = sld [smem:[#allocation8_spill]]  ;;  %v95_v26 = vld [vmem:[%s5524_s0 + $0x48] sm:$0xff]  ;;  %v96_v28 = vld [vmem:[%s5524_s0 + $0x50] sm:$0xff]  ;;  %v97_v30 = vld [vmem:[%s5524_s0 + $0x58] sm:$0xff] }
   0x8   :  { %5534 = sst [smem:[#allocation10_spill]] %s5508_s8  ;;  %v68_v0 = vld [vmem:[%s5536_s27] sm:$0xff]  ;;  %s5538_s8 = sld [smem:[#allocation5_spill]]  ;;  %v111_v27 = vld [vmem:[%s5524_s0 + $0xc8] sm:$0xff]  ;;  %v112_v29 = vld [vmem:[%s5524_s0 + $0xd0] sm:$0xff] }
   0x9   :  { %5535 = sst [smem:[#allocation11_spill]] %s5509_s9  ;;  %v71_v1 = vld [vmem:[%s5537_s3] sm:$0xff]  ;;  %70 = vst.msk [vmem:[%s5518_s18] sm:$0xff] %vm69_vm3, %v68_v0  ;;  %s5542_s27 = sld [smem:[#allocation9_spill]]  ;;  %v113_v31 = vld [vmem:[%s5524_s0 + $0xd8] sm:$0xff]  ;;  %v99_v34 = vld [vmem:[%s5524_s0 + $0x68] sm:$0xff] }
   0xa   :  { %72 = vst.msk [vmem:[%s5519_s19] sm:$0xff] %vm69_vm3, %v71_v1  ;;  %s5543_s3 = sld [smem:[#allocation10_spill]]  ;;  %v98_v32 = vld [vmem:[%s5524_s0 + $0x60] sm:$0xff]  ;;  %v115_v35 = vld [vmem:[%s5524_s0 + $0xe8] sm:$0xff]  ;;  %v100_v36 = vld [vmem:[%s5524_s0 + $0x70] sm:$0xff] }
   0xb   :  { %v76_v3 = vld [vmem:[%s5539_s5] sm:$0xff]  ;;  %v116_v37 = vld [vmem:[%s5524_s0 + $0xf0] sm:$0xff]  ;;  %v101_v38 = vld [vmem:[%s5524_s0 + $0x78] sm:$0xff] }
   0xc   :  { %v78_v4 = vld [vmem:[%s5540_s26] sm:$0xff]  ;;  %77 = vst.msk [vmem:[%s5521_s21] sm:$0xff] %vm74_vm0, %v76_v3  ;;  %v117_v39 = vld [vmem:[%s5524_s0 + $0xf8] sm:$0xff] }
   0xd   :  { %v81_v5 = vld [vmem:[%s5541_s7] sm:$0xff]  ;;  %80 = vst.msk [vmem:[%s5522_s22] sm:$0xff] %vm79_vm1, %v78_v4 }
   0xe   :  { %v73_v2 = vld [vmem:[%s5538_s8] sm:$0xff]  ;;  %82 = vst.msk [vmem:[%s5523_s23] sm:$0xff] %vm79_vm1, %v81_v5 }
   0xf   :  { %75 = vst.msk [vmem:[%s5520_s20] sm:$0xff] %vm74_vm0, %v73_v2  ;;  %v83_v6 = vld [vmem:[%s5542_s27] sm:$0xff] }
  0x10   :  { %v118_v7 = vld [vmem:[%s5543_s3] sm:$0xff]  ;;  %85 = vst.msk [vmem:[%s5525_s24] sm:$0xff] %vm84_vm2, %v83_v6 }
  0x11   :  { %3498 = vmatprep.subr.mxu0 %v118_v7  ;;  %4288 = vmatprep.subr.mxu1 %v118_v7  ;;  %v114_v33 = vld [vmem:[%s5524_s0 + $0xe0] sm:$0xff] }
  0x12   :  { %3499 = vmatpush3.msra.mxu0 %v118_v7  ;;  %4289 = vmatpush3.msra.mxu1 %v118_v7  ;;  %v4796_v40 = vld [vmem:[%s5518_s18] sm:$0xff]  }
  0x13   :  { %3501 = vmatmul.mubr.msk.f32.vlgmr.msra.gmra.mrb[0].mxu0 %vm119_vm4, %v87_v10  ;;  %3525 = vmatmul.mubr.msk.f32.vlgmr.msra.gmra.mrb[0].mxu1 %vm119_vm4, %v103_v11  ;;  %v4801_v41 = vld [vmem:[%s5519_s19] sm:$0xff]  }
  0x14   :  { %3503 = vmatprep.mubr.msk.f32.mxu0 %vm119_vm4, %v88_v12  ;;  %3527 = vmatprep.mubr.msk.f32.mxu1 %vm119_vm4, %v104_v13  ;;  %v4811_v43 = vld [vmem:[%s5521_s21] sm:$0xff]  }
  0x15   :  { %v4816_v44 = vld [vmem:[%s5522_s22] sm:$0xff]  }
  0x16   :  { %v4806_v42 = vld [vmem:[%s5520_s20] sm:$0xff]  }
  0x17   :  { %3504 = vmatmul.mubr.msk.f32.gmra.mrb[2].mxu0 %vm119_vm4, %v89_v14  ;;  %3528 = vmatmul.mubr.msk.f32.gmra.mrb[2].mxu1 %vm119_vm4, %v105_v15  ;;  %v4821_v45 = vld [vmem:[%s5523_s23] sm:$0xff]  }
  0x18   :  { %3506 = vmatprep.mubr.msk.f32.mxu0 %vm119_vm4, %v90_v16  ;;  %3530 = vmatprep.mubr.msk.f32.mxu1 %vm119_vm4, %v106_v17  ;;  %v4826_v46 = vld [vmem:[%s5525_s24] sm:$0xff]  }
  0x1b   :  { %3507 = vmatmul.mubr.msk.f32.gmra.mrb[4].mxu0 %vm119_vm4, %v91_v18  ;;  %3531 = vmatmul.mubr.msk.f32.gmra.mrb[4].mxu1 %vm119_vm4, %v107_v19 }
  0x1c   :  { %3509 = vmatprep.mubr.msk.f32.mxu0 %vm119_vm4, %v92_v20  ;;  %3533 = vmatprep.mubr.msk.f32.mxu1 %vm119_vm4, %v108_v21 }
  0x1f   :  { %3510 = vmatmul.mubr.msk.f32.gmra.mrb[6].mxu0 %vm119_vm4, %v93_v22  ;;  %3534 = vmatmul.mubr.msk.f32.gmra.mrb[6].mxu1 %vm119_vm4, %v109_v23 }
  0x20   :  { %3512 = vmatprep.mubr.msk.f32.mxu0 %vm119_vm4, %v94_v24  ;;  %3536 = vmatprep.mubr.msk.f32.mxu1 %vm119_vm4, %v110_v25 }
  0x23   :  { %3513 = vmatmul.mubr.msk.f32.gmra.mrb[8].mxu0 %vm119_vm4, %v95_v26  ;;  %3537 = vmatmul.mubr.msk.f32.gmra.mrb[8].mxu1 %vm119_vm4, %v111_v27 }
  0x24   :  { %3515 = vmatprep.mubr.msk.f32.mxu0 %vm119_vm4, %v96_v28  ;;  %3539 = vmatprep.mubr.msk.f32.mxu1 %vm119_vm4, %v112_v29 }
  0x27   :  { %3516 = vmatmul.mubr.msk.f32.gmra.mrb[10].mxu0 %vm119_vm4, %v97_v30  ;;  %3540 = vmatmul.mubr.msk.f32.gmra.mrb[10].mxu1 %vm119_vm4, %v113_v31 }
  0x28   :  { %3518 = vmatprep.mubr.msk.f32.mxu0 %vm119_vm4, %v98_v32  ;;  %3542 = vmatprep.mubr.msk.f32.mxu1 %vm119_vm4, %v114_v33 }
  0x2b   :  { %3519 = vmatmul.mubr.msk.f32.gmra.mrb[12].mxu0 %vm119_vm4, %v99_v34  ;;  %3543 = vmatmul.mubr.msk.f32.gmra.mrb[12].mxu1 %vm119_vm4, %v115_v35 }
  0x2c   :  { %3521 = vmatprep.mubr.msk.f32.mxu0 %vm119_vm4, %v100_v36  ;;  %3545 = vmatprep.mubr.msk.f32.mxu1 %vm119_vm4, %v116_v37 }
  0x2f   :  { %3522 = vmatmul.mubr.msk.f32.gmra.mrb[14].mxu0 %vm119_vm4, %v101_v38  ;;  %3546 = vmatmul.mubr.msk.f32.gmra.mrb[14].mxu1 %vm119_vm4, %v117_v39 }
  0xe6   :  { %v3502_v47 = vpop.f32.mrb[0].mxu0  ;;  %v3526_v48 = vpop.f32.mrb[0].mxu1 }
  0xe7   :  { %443 = vst.msk [vmem:[#allocation2 + $0x8] sm:$0xff] %vm69_vm3, %v3502_v47  ;;  %459 = vst.msk [vmem:[#allocation2 + $0x88] sm:$0xff] %vm69_vm3, %v3526_v48  ;;  %v282_v49 = vpop.f32.mrb[1].mxu0  ;;  %v362_v50 = vpop.f32.mrb[1].mxu1 }
  0xe8   :  { %442 = vst.msk [vmem:[#allocation2] sm:$0xff] %vm69_vm3, %v282_v49  ;;  %458 = vst.msk [vmem:[#allocation2 + $0x80] sm:$0xff] %vm69_vm3, %v362_v50 }
  0xea   :  { %v3505_v51 = vpop.f32.mrb[2].mxu0  ;;  %v3529_v52 = vpop.f32.mrb[2].mxu1 }
  0xeb   :  { %445 = vst.msk [vmem:[#allocation2 + $0x18] sm:$0xff] %vm69_vm3, %v3505_v51  ;;  %461 = vst.msk [vmem:[#allocation2 + $0x98] sm:$0xff] %vm69_vm3, %v3529_v52  ;;  %v292_v53 = vpop.f32.mrb[3].mxu0  ;;  %v372_v54 = vpop.f32.mrb[3].mxu1 }
  0xec   :  { %444 = vst.msk [vmem:[#allocation2 + $0x10] sm:$0xff] %vm69_vm3, %v292_v53  ;;  %460 = vst.msk [vmem:[#allocation2 + $0x90] sm:$0xff] %vm69_vm3, %v372_v54 }
  0xee   :  { %v3508_v55 = vpop.f32.mrb[4].mxu0  ;;  %v3532_v56 = vpop.f32.mrb[4].mxu1 }
  0xef   :  { %447 = vst.msk [vmem:[#allocation2 + $0x28] sm:$0xff] %vm69_vm3, %v3508_v55  ;;  %463 = vst.msk [vmem:[#allocation2 + $0xa8] sm:$0xff] %vm69_vm3, %v3532_v56  ;;  %v302_v57 = vpop.f32.mrb[5].mxu0  ;;  %v382_v58 = vpop.f32.mrb[5].mxu1 }
  0xf0   :  { %446 = vst.msk [vmem:[#allocation2 + $0x20] sm:$0xff] %vm69_vm3, %v302_v57  ;;  %462 = vst.msk [vmem:[#allocation2 + $0xa0] sm:$0xff] %vm69_vm3, %v382_v58 }
  0xf2   :  { %v3511_v59 = vpop.f32.mrb[6].mxu0  ;;  %v3535_v60 = vpop.f32.mrb[6].mxu1 }
  0xf3   :  { %449 = vst.msk [vmem:[#allocation2 + $0x38] sm:$0xff] %vm69_vm3, %v3511_v59  ;;  %465 = vst.msk [vmem:[#allocation2 + $0xb8] sm:$0xff] %vm69_vm3, %v3535_v60  ;;  %v312_v61 = vpop.f32.mrb[7].mxu0  ;;  %v392_v62 = vpop.f32.mrb[7].mxu1 }
  0xf4   :  { %448 = vst.msk [vmem:[#allocation2 + $0x30] sm:$0xff] %vm69_vm3, %v312_v61  ;;  %464 = vst.msk [vmem:[#allocation2 + $0xb0] sm:$0xff] %vm69_vm3, %v392_v62 }
  0xf6   :  { %v3514_v63 = vpop.f32.mrb[8].mxu0  ;;  %v3538_v0 = vpop.f32.mrb[8].mxu1 }
  0xf7   :  { %451 = vst.msk [vmem:[#allocation2 + $0x48] sm:$0xff] %vm69_vm3, %v3514_v63  ;;  %467 = vst.msk [vmem:[#allocation2 + $0xc8] sm:$0xff] %vm69_vm3, %v3538_v0  ;;  %v322_v1 = vpop.f32.mrb[9].mxu0  ;;  %v402_v2 = vpop.f32.mrb[9].mxu1 }
  0xf8   :  { %450 = vst.msk [vmem:[#allocation2 + $0x40] sm:$0xff] %vm69_vm3, %v322_v1  ;;  %466 = vst.msk [vmem:[#allocation2 + $0xc0] sm:$0xff] %vm69_vm3, %v402_v2 }
  0xfa   :  { %v3517_v3 = vpop.f32.mrb[10].mxu0  ;;  %v3541_v4 = vpop.f32.mrb[10].mxu1 }
  0xfb   :  { %453 = vst.msk [vmem:[#allocation2 + $0x58] sm:$0xff] %vm69_vm3, %v3517_v3  ;;  %469 = vst.msk [vmem:[#allocation2 + $0xd8] sm:$0xff] %vm69_vm3, %v3541_v4  ;;  %v332_v5 = vpop.f32.mrb[11].mxu0  ;;  %v412_v6 = vpop.f32.mrb[11].mxu1 }
  0xfc   :  { %452 = vst.msk [vmem:[#allocation2 + $0x50] sm:$0xff] %vm69_vm3, %v332_v5  ;;  %468 = vst.msk [vmem:[#allocation2 + $0xd0] sm:$0xff] %vm69_vm3, %v412_v6 }
  0xfe   :  { %v3520_v7 = vpop.f32.mrb[12].mxu0  ;;  %v3544_v8 = vpop.f32.mrb[12].mxu1 }
  0xff   :  { %455 = vst.msk [vmem:[#allocation2 + $0x68] sm:$0xff] %vm69_vm3, %v3520_v7  ;;  %471 = vst.msk [vmem:[#allocation2 + $0xe8] sm:$0xff] %vm69_vm3, %v3544_v8  ;;  %v342_v9 = vpop.f32.mrb[13].mxu0  ;;  %v422_v10 = vpop.f32.mrb[13].mxu1 }
 0x100   :  { %454 = vst.msk [vmem:[#allocation2 + $0x60] sm:$0xff] %vm69_vm3, %v342_v9  ;;  %470 = vst.msk [vmem:[#allocation2 + $0xe0] sm:$0xff] %vm69_vm3, %v422_v10 }
 0x102   :  { %v3523_v11 = vpop.f32.mrb[14].mxu0  ;;  %v3547_v12 = vpop.f32.mrb[14].mxu1 }
 0x103   :  { %457 = vst.msk [vmem:[#allocation2 + $0x78] sm:$0xff] %vm69_vm3, %v3523_v11  ;;  %473 = vst.msk [vmem:[#allocation2 + $0xf8] sm:$0xff] %vm69_vm3, %v3547_v12  ;;  %v352_v13 = vpop.f32.mrb[15].mxu0  ;;  %v432_v14 = vpop.f32.mrb[15].mxu1 }
 0x104   :  { %456 = vst.msk [vmem:[#allocation2 + $0x70] sm:$0xff] %vm69_vm3, %v352_v13  ;;  %472 = vst.msk [vmem:[#allocation2 + $0xf0] sm:$0xff] %vm69_vm3, %v432_v14 }
 0x105 LB: > { %s5544_s5 = sld [smem:[#allocation11_spill]]  ;;  %v4485_v18 = vmov 0.0|0.0   ;;  %vm4486_vm5 = vmmov 0   ;;  %v4487_v21 = vmov 0.0   ;;  %v584_v23 = vld [vmem:[%s5511_s11] sm:$0xff]  ;;  %v585_v24 = vld [vmem:[%s5511_s11 + $0x8] sm:$0xff]  ;;  %s4483_s4 = sphi %s4881_s4, %s486_s4   ;;  %v4479_v40 = vphi %v4796_v40, %v5551_v40   ;;  %v4475_v41 = vphi %v4801_v41, %v5550_v41   ;;  %v4471_v42 = vphi %v4806_v42, %v5549_v42   ;;  %v4467_v43 = vphi %v4811_v43, %v5548_v43   ;;  %v4463_v44 = vphi %v4816_v44, %v5547_v44   ;;  %v4459_v45 = vphi %v4821_v45, %v5546_v45   ;;  %v4455_v46 = vphi %v4826_v46, %v5545_v46  }
 0x106   : > { %4012 = vmatprep.subr.bf16.mxu1 %v4485_v18  ;;  %3556 = vmatprep.mubr.msk.f32.mxu1 %vm4486_vm5, %v4487_v21  ;;  %v4934_v25 = vpack.c.bf16 %v585_v24, %v584_v23  ;;  %v586_v26 = vld [vmem:[%s5511_s11 + $0x10] sm:$0xff]  ;;  %v587_v27 = vld [vmem:[%s5511_s11 + $0x18] sm:$0xff]  ;;  %v588_v29 = vld [vmem:[%s5511_s11 + $0x20] sm:$0xff]  ;;  %s3242_s8 = sshll.u32 %s4483_s4, 5  ;;  %v576_v55 = vmul.f32 0.9, %v4479_v40 }
 0x107   : > { %4033 = vmatprep.subr.bf16.mxu0 %v4485_v18  ;;  %3601 = vmatprep.mubr.msk.f32.mxu0 %vm4486_vm5, %v4487_v21  ;;  %v4948_v28 = vpack.c.bf16 %v587_v27, %v586_v26  ;;  %v589_v30 = vld [vmem:[%s5511_s11 + $0x28] sm:$0xff]  ;;  %v580_v32 = vld [vmem:[%s5510_s10] sm:$0xff]  ;;  %v582_v35 = vld [vmem:[%s5510_s10 + $0x10] sm:$0xff]  ;;  %s5018_s30 = scalar_lea.vmem [#allocation2], %s3242_s8  ;;  %s5248_s0 = scalar_lea.vmem %s5517_s17, %s3242_s8 }
 0x108   : > { %v4958_v31 = vpack.c.bf16 %v589_v30, %v588_v29  ;;  %v581_v33 = vld [vmem:[%s5510_s10 + $0x8] sm:$0xff]  ;;  %v583_v36 = vld [vmem:[%s5510_s10 + $0x18] sm:$0xff]  ;;  %v747_v38 = vld [vmem:[%s5513_s13] sm:$0xff]  ;;  %s486_s4 = sadd.s32 1, %s4483_s4  }
 0x109   : > { %v4968_v34 = vpack.c.bf16 %v581_v33, %v580_v32  ;;  %v4978_v37 = vpack.c.bf16 %v583_v36, %v582_v35  ;;  %v748_v39 = vld [vmem:[%s5513_s13 + $0x8] sm:$0xff]  ;;  %v750_v47 = vld [vmem:[%s5513_s13 + $0x18] sm:$0xff]  ;;  %v751_v49 = vld [vmem:[%s5513_s13 + $0x20] sm:$0xff]  ;;  %p483_p0 = scmp.ge.s32.totalorder %s486_s4, 8  }
 0x10a   : > { %v752_v50 = vld [vmem:[%s5513_s13 + $0x28] sm:$0xff]  ;;  %v753_v60 = vld [vmem:[%s5513_s13 + $0x30] sm:$0xff]  ;;  %v754_v40 = vld [vmem:[%s5513_s13 + $0x38] sm:$0xff] }
 0x10b   : > { %v498_v15 = vld [vmem:[%s5544_s5] sm:$0xff]  ;;  %v499_v16 = vld [vmem:[%s5544_s5 + $0x8] sm:$0xff]  ;;  %v500_v17 = vld [vmem:[%s5544_s5 + $0x10] sm:$0xff]  ;;  %v5010_v51 = vpack.c.bf16 %v752_v50, %v751_v49  ;;  %v5037_v61 = vpack.c.bf16 %v754_v40, %v753_v60 }
 0x10c   : > { %v4913_v19 = vpack.c.bf16 %v499_v16, %v498_v15  ;;  %v501_v20 = vld [vmem:[%s5544_s5 + $0x18] sm:$0xff]  ;;  %v497_v52 = vld [vmem:[%s5018_s30] sm:$0xff]  ;;  %v742_v63 = vld [vmem:[%s5512_s12 + $0x8] sm:$0xff]  ;;  %v737_v15 = vmul.f32 0.875, %v4471_v42 }
 0x10d   : > { %v4924_v22 = vpack.c.bf16 %v501_v20, %v500_v17  ;;  %v741_v62 = vld [vmem:[%s5512_s12] sm:$0xff]  ;;  %v911_v2 = vld [vmem:[%s5515_s15 + $0x8] sm:$0xff]  ;;  %v743_v4 = vld [vmem:[%s5512_s12 + $0x10] sm:$0xff] }
 0x10e   : > { %4014 = vmatpush3.bf16.msra.mxu1 %v4913_v19  ;;  %v5047_v0 = vpack.c.bf16 %v742_v63, %v741_v62  ;;  %v910_v1 = vld [vmem:[%s5515_s15] sm:$0xff]  ;;  %v744_v5 = vld [vmem:[%s5512_s12 + $0x18] sm:$0xff]  ;;  %v912_v6 = vld [vmem:[%s5515_s15 + $0x10] sm:$0xff] }
 0x10f   : > { %4015 = vmatprep.subr.bf16.mxu1 %v4485_v18  ;;  %v5055_v3 = vpack.c.bf16 %v911_v2, %v910_v1  ;;  %v5071_v7 = vpack.c.bf16 %v744_v5, %v743_v4  ;;  %v745_v8 = vld [vmem:[%s5512_s12 + $0x20] sm:$0xff]  ;;  %v746_v9 = vld [vmem:[%s5512_s12 + $0x28] sm:$0xff]  ;;  %v908_v42 = vld [vmem:[%s5514_s14 + $0x10] sm:$0xff] }
 0x110   : > { %v914_v11 = vld [vmem:[%s5515_s15 + $0x20] sm:$0xff]  ;;  %v915_v12 = vld [vmem:[%s5515_s15 + $0x28] sm:$0xff]  ;;  %v5095_v13 = vpack.c.bf16 %v746_v9, %v745_v8  ;;  %v909_v29 = vld [vmem:[%s5514_s14 + $0x18] sm:$0xff] }
 0x111   : > { %v5097_v14 = vpack.c.bf16 %v915_v12, %v914_v11  ;;  %v906_v24 = vld [vmem:[%s5514_s14] sm:$0xff]  ;;  %v907_v26 = vld [vmem:[%s5514_s14 + $0x8] sm:$0xff]  ;;  %v5127_v32 = vpack.c.bf16 %v909_v29, %v908_v42 }
 0x112   : > { %4017 = vmatpush3.bf16.msra.mxu1 %v4924_v22  ;;  %v5115_v27 = vpack.c.bf16 %v907_v26, %v906_v24  ;;  %v1056_v33 = vld [vmem:[%s5516_s16] sm:$0xff]  ;;  %v1057_v35 = vld [vmem:[%s5516_s16 + $0x8] sm:$0xff] }
 0x113   : > { %4018 = vmatprep.subr.bf16.mxu1 %v4485_v18  ;;  %v5166_v36 = vpack.c.bf16 %v1057_v35, %v1056_v33  ;;  %v1061_v49 = vld [vmem:[%s5516_s16 + $0x28] sm:$0xff]  ;;  %v3216_v33 = vld [vmem:[%s5018_s30 + $0x10] sm:$0xff] }
 0x114   : > { %v3202_v40 = vld [vmem:[%s5018_s30 + $0x8] sm:$0xff] }
 0x115   : > { %3557 = vmatmul.mubr.msk.f32.vlgmr.msra.gmra.mrb[0].mxu1 %vm69_vm3, %v4475_v41  ;;  %v749_v41 = vld [vmem:[%s5513_s13 + $0x10] sm:$0xff] }
 0x116   : > { %4020 = vmatpush3.bf16.msra.mxu1 %v4934_v25  ;;  %3571 = vmatprep.mubr.msk.f32.mxu1 %vm4486_vm5, %v4487_v21  ;;  %v5000_v48 = vpack.c.bf16 %v750_v47, %v749_v41  ;;  %v1060_v47 = vld [vmem:[%s5516_s16 + $0x20] sm:$0xff] }
 0x117   : > { %4021 = vmatprep.subr.bf16.mxu1 %v4485_v18  ;;  %v5186_v50 = vpack.c.bf16 %v1061_v49, %v1060_v47 }
 0x11a   : > { %4023 = vmatpush3.bf16.msra.mxu1 %v4948_v28 }
 0x11b   : > { %4024 = vmatprep.subr.bf16.mxu1 %v4485_v18 }
 0x11e   : > { %4026 = vmatpush3.bf16.msra.mxu1 %v4958_v31 }
 0x11f   : > { %4027 = vmatprep.subr.bf16.mxu1 %v4485_v18 }
 0x121   : > { %3572 = vmatmul.mubr.msk.f32.vlgmr.msra.gmra.mrb[2].mxu1 %vm74_vm0, %v4467_v43  ;;  %v4994_v43 = vpack.c.bf16 %v748_v39, %v747_v38  ;;  %v1058_v38 = vld [vmem:[%s5516_s16 + $0x10] sm:$0xff]  ;;  %v1059_v39 = vld [vmem:[%s5516_s16 + $0x18] sm:$0xff] }
 0x122   : > { %4029 = vmatpush3.bf16.msra.mxu1 %v4968_v34  ;;  %3582 = vmatprep.mubr.msk.f32.mxu1 %vm4486_vm5, %v4487_v21  ;;  %v5176_v41 = vpack.c.bf16 %v1059_v39, %v1058_v38 }
 0x123   : > { %4030 = vmatprep.subr.bf16.mxu1 %v4485_v18  ;;  %4035 = vmatpush3.bf16.msra.mxu0 %v4994_v43 }
 0x124   : > { %4036 = vmatprep.subr.bf16.mxu0 %v4485_v18 }
 0x126   : > { %4032 = vmatpush3.bf16.msra.mxu1 %v4978_v37 }
 0x127   : > { %4054 = vmatprep.subr.bf16.mxu1 %v4485_v18  ;;  %4038 = vmatpush3.bf16.msra.mxu0 %v5000_v48 }
 0x128   : > { %4039 = vmatprep.subr.bf16.mxu0 %v4485_v18 }
 0x12b   : > { %4041 = vmatpush3.bf16.msra.mxu0 %v5010_v51 }
 0x12c   : > { %4042 = vmatprep.subr.bf16.mxu0 %v4485_v18 }
 0x12f   : > { %4044 = vmatpush3.bf16.msra.mxu0 %v5037_v61 }
 0x130   : > { %4045 = vmatprep.subr.bf16.mxu0 %v4485_v18 }
 0x132   : > { %3602 = vmatmul.mubr.msk.f32.vlgmr.msra.gmra.mrb[0].mxu0 %vm79_vm1, %v4459_v45  ;;  %v913_v45 = vld [vmem:[%s5515_s15 + $0x18] sm:$0xff] }
 0x133   : > { %4047 = vmatpush3.bf16.msra.mxu0 %v5047_v0  ;;  %v5083_v10 = vpack.c.bf16 %v913_v45, %v912_v6  ;;  %3616 = vmatprep.mubr.msk.f32.mxu0 %vm4486_vm5, %v4487_v21 }
 0x134   : > { %4048 = vmatprep.subr.bf16.mxu0 %v4485_v18 }
 0x137   : > { %4050 = vmatpush3.bf16.msra.mxu0 %v5071_v7 }
 0x138   : > { %4051 = vmatprep.subr.bf16.mxu0 %v4485_v18 }
 0x13b   : > { %4053 = vmatpush3.bf16.msra.mxu0 %v5095_v13 }
 0x13c   : > { %4081 = vmatprep.subr.bf16.mxu0 %v4485_v18 }
 0x1e8   : > { %v571_v53 = vpop.f32.mrb[0].mxu1 }
 0x1e9   : > { %v575_v54 = vadd.f32 %v571_v53, %v497_v52  ;;  %v3558_v56 = vpop.f32.mrb[1].mxu1  ;;  %v1062_v52 = vld [vmem:[%s5516_s16 + $0x30] sm:$0xff]  ;;  %v1063_v53 = vld [vmem:[%s5516_s16 + $0x38] sm:$0xff] }
 0x1eb   : > { %v577_v57 = vmul.f32 0.1, %v575_v54  ;;  %v5196_v54 = vpack.c.bf16 %v1063_v53, %v1062_v52 }
 0x1ed   : > { %v5022_v58 = vadd.f32 %v577_v57, %v576_v55  ;;  %v902_v55 = vmul.f32 0.8333333, %v4463_v44 }
 0x1ef   : > { %4389 = vtanh.f32 %v5022_v58  ;;  %v1224_v2 = vmul.f32 0.9, %v5022_v58  ;;  %v1138_v58 = vmul.f32 0.95, %v4455_v46 }
 0x1f9   : > { %v5025_v59 = vpop.eup %4389 }
 0x1fa   : > { %3583 = vmatmul.mubr.msk.f32.vlgmr.msra.gmra.mrb[2].mxu1 %vm69_vm3, %v5025_v59 }
 0x1fb   : > { %3631 = vmatprep.mubr.msk.f32.mxu1 %vm4486_vm5, %v4487_v21  ;;  %4056 = vmatpush3.bf16.msra.mxu1 %v5055_v3 }
 0x1fc   : > { %4057 = vmatprep.subr.bf16.mxu1 %v4485_v18 }
 0x1ff   : > { %4059 = vmatpush3.bf16.msra.mxu1 %v5083_v10 }
 0x200   : > { %4060 = vmatprep.subr.bf16.mxu1 %v4485_v18 }
 0x203   : > { %4062 = vmatpush3.bf16.msra.mxu1 %v5097_v14 }
 0x204   : > { %4063 = vmatprep.subr.bf16.mxu1 %v4485_v18 }
 0x2cd   : > { %v733_v16 = vpop.f32.mrb[2].mxu1 }
 0x2ce   : > { %v738_v17 = vmul.f32 0.125, %v733_v16  ;;  %v3584_v20 = vpop.f32.mrb[3].mxu1 }
 0x2d0   : > { %v5106_v23 = vadd.f32 %v738_v17, %v737_v15 }
 0x2d2   : > { %4391 = vtanh.f32 %v5106_v23  ;;  %v1381_v15 = vmul.f32 0.875, %v5106_v23 }
 0x2dc   : > { %v4392_v30 = vpop.eup %4391 }
 0x2dd   : > { %3617 = vmatmul.mubr.msk.f32.vlgmr.msra.gmra.mrb[0].mxu0 %vm74_vm0, %v4392_v30  ;;  %3632 = vmatmul.mubr.msk.f32.vlgmr.msra.gmra.mrb[4].mxu1 %vm74_vm0, %v4392_v30 }
 0x2de   : > { %4083 = vmatpush3.bf16.msra.mxu0 %v4913_v19  ;;  %4065 = vmatpush3.bf16.msra.mxu1 %v5115_v27 }
 0x2df   : > { %4084 = vmatprep.subr.bf16.mxu0 %v4485_v18  ;;  %4066 = vmatprep.subr.bf16.mxu1 %v4485_v18 }
 0x2e0   : > { %3672 = vmatprep.mubr.msk.f32.mxu0 %vm4486_vm5, %v4487_v21  ;;  %3642 = vmatprep.mubr.msk.f32.mxu1 %vm4486_vm5, %v4487_v21 }
 0x2e2   : > { %4086 = vmatpush3.bf16.msra.mxu0 %v4924_v22  ;;  %4068 = vmatpush3.bf16.msra.mxu1 %v5127_v32 }
 0x2e3   : > { %4087 = vmatprep.subr.bf16.mxu0 %v4485_v18  ;;  %4069 = vmatprep.subr.bf16.mxu1 %v4485_v18 }
 0x2e5   : > { %3673 = vmatmul.mubr.msk.f32.vlgmr.msra.gmra.mrb[2].mxu0 %vm69_vm3, %v5025_v59  ;;  %3643 = vmatmul.mubr.msk.f32.vlgmr.msra.gmra.mrb[4].mxu1 %vm69_vm3, %v5025_v59 }
 0x2e6   : > { %4089 = vmatpush3.bf16.msra.mxu0 %v4934_v25  ;;  %3687 = vmatprep.mubr.msk.f32.mxu0 %vm4486_vm5, %v4487_v21 }
 0x2e7   : > { %4090 = vmatprep.subr.bf16.mxu0 %v4485_v18  ;;  %3661 = vmatprep.mubr.msk.f32.mxu1 %vm4486_vm5, %v4487_v21 }
 0x2e8   : > { %4071 = vmatpush3.bf16.msra.mxu1 %v5166_v36 }
 0x2e9   : > { %4072 = vmatprep.subr.bf16.mxu1 %v4485_v18 }
 0x2ea   : > { %4092 = vmatpush3.bf16.msra.mxu0 %v4948_v28 }
 0x2eb   : > { %4093 = vmatprep.subr.bf16.mxu0 %v4485_v18 }
 0x2ec   : > { %4074 = vmatpush3.bf16.msra.mxu1 %v5176_v41 }
 0x2ed   : > { %4075 = vmatprep.subr.bf16.mxu1 %v4485_v18 }
 0x2ee   : > { %4095 = vmatpush3.bf16.msra.mxu0 %v4958_v31 }
 0x2ef   : > { %4096 = vmatprep.subr.bf16.mxu0 %v4485_v18 }
 0x2f0   : > { %4077 = vmatpush3.bf16.msra.mxu1 %v5186_v50 }
 0x2f1   : > { %3688 = vmatmul.mubr.msk.f32.vlgmr.msra.gmra.mrb[4].mxu0 %vm74_vm0, %v4392_v30  ;;  %4078 = vmatprep.subr.bf16.mxu1 %v4485_v18 }
 0x2f2   : > { %4098 = vmatpush3.bf16.msra.mxu0 %v4968_v34  ;;  %3698 = vmatprep.mubr.msk.f32.mxu0 %vm4486_vm5, %v4487_v21 }
 0x2f3   : > { %4099 = vmatprep.subr.bf16.mxu0 %v4485_v18 }
 0x2f4   : > { %4080 = vmatpush3.bf16.msra.mxu1 %v5196_v54 }
 0x2f5   : > { %4102 = vmatprep.subr.bf16.mxu1 %v4485_v18 }
 0x2f6   : > { %4101 = vmatpush3.bf16.msra.mxu0 %v4978_v37 }
 0x2f7   : > { %4123 = vmatprep.subr.bf16.mxu0 %v4485_v18 }
 0x3b0   : > { %v898_v56 = vpop.f32.mrb[0].mxu0 }
 0x3b1   : > { %v903_v57 = vmul.f32 0.16666667, %v898_v56  ;;  %v3618_v59 = vpop.f32.mrb[1].mxu0 }
 0x3b3   : > { %v5201_v60 = vadd.f32 %v903_v57, %v902_v55 }
 0x3b5   : > { %4393 = vtanh.f32 %v5201_v60  ;;  %v1542_v26 = vmul.f32 0.8333333, %v5201_v60 }
 0x3b8   : > { %v1219_v62 = vpop.f32.mrb[2].mxu0 }
 0x3b9   : > { %v1223_v63 = vadd.f32 %v3202_v40, %v1219_v62  ;;  %v3674_v1 = vpop.f32.mrb[3].mxu0 }
 0x3bb   : > { %v1225_v4 = vmul.f32 0.1, %v1223_v63 }
 0x3bd   : > { %v5206_v5 = vadd.f32 %v1225_v4, %v1224_v2 }
 0x3bf   : > { %v4394_v6 = vpop.eup %4393  ;;  %4395 = vtanh.f32 %v5206_v5  ;;  %v1863_v47 = vmul.f32 0.9, %v5206_v5 }
 0x3c0   : > { %3662 = vmatmul.mubr.msk.f32.vlgmr.msra.gmra.mrb[4].mxu1 %vm79_vm1, %v4394_v6 }
 0x3c1   : > { %4104 = vmatpush3.bf16.msra.mxu1 %v4994_v43  ;;  %3717 = vmatprep.mubr.msk.f32.mxu1 %vm4486_vm5, %v4487_v21 }
 0x3c2   : > { %4105 = vmatprep.subr.bf16.mxu1 %v4485_v18 }
 0x3c5   : > { %4107 = vmatpush3.bf16.msra.mxu1 %v5000_v48 }
 0x3c6   : > { %4108 = vmatprep.subr.bf16.mxu1 %v4485_v18 }
 0x3c9   : > { %v4396_v44 = vpop.eup %4395  ;;  %4110 = vmatpush3.bf16.msra.mxu1 %v5010_v51 }
 0x3ca   : > { %3699 = vmatmul.mubr.msk.f32.vlgmr.msra.gmra.mrb[4].mxu0 %vm69_vm3, %v4396_v44  ;;  %4111 = vmatprep.subr.bf16.mxu1 %v4485_v18 }
 0x3cb   : > { %4125 = vmatpush3.bf16.msra.mxu0 %v5055_v3  ;;  %3747 = vmatprep.mubr.msk.f32.mxu0 %vm4486_vm5, %v4487_v21 }
 0x3cc   : > { %4126 = vmatprep.subr.bf16.mxu0 %v4485_v18 }
 0x3cd   : > { %4113 = vmatpush3.bf16.msra.mxu1 %v5037_v61 }
 0x3ce   : > { %4114 = vmatprep.subr.bf16.mxu1 %v4485_v18 }
 0x3cf   : > { %4128 = vmatpush3.bf16.msra.mxu0 %v5083_v10 }
 0x3d0   : > { %3718 = vmatmul.mubr.msk.f32.vlgmr.msra.gmra.mrb[6].mxu1 %vm79_vm1, %v4394_v6  ;;  %4129 = vmatprep.subr.bf16.mxu0 %v4485_v18 }
 0x3d1   : > { %4116 = vmatpush3.bf16.msra.mxu1 %v5047_v0  ;;  %3732 = vmatprep.mubr.msk.f32.mxu1 %vm4486_vm5, %v4487_v21 }
 0x3d2   : > { %4117 = vmatprep.subr.bf16.mxu1 %v4485_v18 }
 0x3d3   : > { %4131 = vmatpush3.bf16.msra.mxu0 %v5097_v14 }
 0x3d4   : > { %4132 = vmatprep.subr.bf16.mxu0 %v4485_v18 }
 0x3d5   : > { %4119 = vmatpush3.bf16.msra.mxu1 %v5071_v7 }
 0x3d6   : > { %4120 = vmatprep.subr.bf16.mxu1 %v4485_v18 }
 0x3d9   : > { %4122 = vmatpush3.bf16.msra.mxu1 %v5095_v13 }
 0x3da   : > { %4150 = vmatprep.subr.bf16.mxu1 %v4485_v18 }
 0x493   : > { %v1133_v45 = vpop.f32.mrb[4].mxu1 }
 0x494   : > { %v1139_v8 = vmul.f32 0.05, %v1133_v45  ;;  %v3663_v9 = vpop.f32.mrb[5].mxu1 }
 0x496   : > { %v5239_v11 = vadd.f32 %v1139_v8, %v1138_v58 }
 0x498   : > { %4397 = vtanh.f32 %v5239_v11  ;;  %v1778_v57 = vmul.f32 0.95, %v5239_v11 }
 0x49d   : > { %v1377_v12 = vpop.f32.mrb[4].mxu0 }
 0x49e   : > { %v1382_v16 = vmul.f32 0.125, %v1377_v12  ;;  %v3700_v17 = vpop.f32.mrb[5].mxu0 }
 0x4a0   : > { %v5250_v46 = vadd.f32 %v1382_v16, %v1381_v15 }
 0x4a2   : > { %v4398_v20 = vpop.eup %4397  ;;  %4399 = vtanh.f32 %v5250_v46  ;;  %v2020_v63 = vmul.f32 0.875, %v5250_v46 }
 0x4a3   : > { %1144 = vst.msk [vmem:[%s5248_s0] sm:$0xff] %vm84_vm2, %v4398_v20 }
 0x4ac   : > { %v4400_v24 = vpop.eup %4399 }
 0x4ad   : > { %3733 = vmatmul.mubr.msk.f32.vlgmr.msra.gmra.mrb[6].mxu1 %vm74_vm0, %v4400_v24  ;;  %3748 = vmatmul.mubr.msk.f32.vlgmr.msra.gmra.mrb[6].mxu0 %vm74_vm0, %v4400_v24 }
 0x4ae   : > { %4152 = vmatpush3.bf16.msra.mxu1 %v4913_v19  ;;  %4134 = vmatpush3.bf16.msra.mxu0 %v5115_v27 }
 0x4af   : > { %4153 = vmatprep.subr.bf16.mxu1 %v4485_v18  ;;  %4135 = vmatprep.subr.bf16.mxu0 %v4485_v18 }
 0x4b0   : > { %3788 = vmatprep.mubr.msk.f32.mxu1 %vm4486_vm5, %v4487_v21  ;;  %3758 = vmatprep.mubr.msk.f32.mxu0 %vm4486_vm5, %v4487_v21 }
 0x4b2   : > { %4155 = vmatpush3.bf16.msra.mxu1 %v4924_v22  ;;  %4137 = vmatpush3.bf16.msra.mxu0 %v5127_v32 }
 0x4b3   : > { %4156 = vmatprep.subr.bf16.mxu1 %v4485_v18  ;;  %4138 = vmatprep.subr.bf16.mxu0 %v4485_v18 }
 0x4b5   : > { %3789 = vmatmul.mubr.msk.f32.vlgmr.msra.gmra.mrb[8].mxu1 %vm69_vm3, %v4396_v44  ;;  %3759 = vmatmul.mubr.msk.f32.vlgmr.msra.gmra.mrb[6].mxu0 %vm69_vm3, %v4396_v44 }
 0x4b6   : > { %4158 = vmatpush3.bf16.msra.mxu1 %v4934_v25  ;;  %3803 = vmatprep.mubr.msk.f32.mxu1 %vm4486_vm5, %v4487_v21 }
 0x4b7   : > { %4159 = vmatprep.subr.bf16.mxu1 %v4485_v18  ;;  %4140 = vmatpush3.bf16.msra.mxu0 %v5166_v36 }
 0x4b8   : > { %4141 = vmatprep.subr.bf16.mxu0 %v4485_v18  ;;  %3777 = vmatprep.mubr.msk.f32.mxu0 %vm4486_vm5, %v4487_v21 }
 0x4ba   : > { %4161 = vmatpush3.bf16.msra.mxu1 %v4948_v28 }
 0x4bb   : > { %4162 = vmatprep.subr.bf16.mxu1 %v4485_v18  ;;  %4143 = vmatpush3.bf16.msra.mxu0 %v5176_v41 }
 0x4bc   : > { %4144 = vmatprep.subr.bf16.mxu0 %v4485_v18 }
 0x4be   : > { %4164 = vmatpush3.bf16.msra.mxu1 %v4958_v31 }
 0x4bf   : > { %4146 = vmatpush3.bf16.msra.mxu0 %v5186_v50  ;;  %4165 = vmatprep.subr.bf16.mxu1 %v4485_v18 }
 0x4c0   : > { %4147 = vmatprep.subr.bf16.mxu0 %v4485_v18 }
 0x4c1   : > { %3804 = vmatmul.mubr.msk.f32.vlgmr.msra.gmra.mrb[10].mxu1 %vm74_vm0, %v4400_v24 }
 0x4c2   : > { %4167 = vmatpush3.bf16.msra.mxu1 %v4968_v34  ;;  %3814 = vmatprep.mubr.msk.f32.mxu1 %vm4486_vm5, %v4487_v21 }
 0x4c3   : > { %4149 = vmatpush3.bf16.msra.mxu0 %v5196_v54  ;;  %4168 = vmatprep.subr.bf16.mxu1 %v4485_v18 }
 0x4c4   : > { %4171 = vmatprep.subr.bf16.mxu0 %v4485_v18 }
 0x4c6   : > { %4170 = vmatpush3.bf16.msra.mxu1 %v4978_v37 }
 0x4c7   : > { %4192 = vmatprep.subr.bf16.mxu1 %v4485_v18 }
 0x580   : > { %v1538_v23 = vpop.f32.mrb[6].mxu1 }
 0x581   : > { %v1543_v42 = vmul.f32 0.16666667, %v1538_v23  ;;  %v3734_v29 = vpop.f32.mrb[7].mxu1 }
 0x583   : > { %v5297_v30 = vadd.f32 %v1543_v42, %v1542_v26 }
 0x585   : > { %4401 = vtanh.f32 %v5297_v30 }
 0x588   : > { %v1858_v35 = vpop.f32.mrb[8].mxu1 }
 0x589   : > { %v1862_v38 = vadd.f32 %v3216_v33, %v1858_v35  ;;  %v3790_v39 = vpop.f32.mrb[9].mxu1 }
 0x58b   : > { %v1864_v49 = vmul.f32 0.1, %v1862_v38 }
 0x58d   : > { %v5302_v52 = vadd.f32 %v1864_v49, %v1863_v47 }
 0x58f   : > { %v4402_v53 = vpop.eup %4401  ;;  %4403 = vtanh.f32 %v5302_v52  ;;  %v2502_v8 = vmul.f32 0.9, %v5302_v52 }
 0x590   : > { %3778 = vmatmul.mubr.msk.f32.vlgmr.msra.gmra.mrb[6].mxu0 %vm79_vm1, %v4402_v53 }
 0x591   : > { %4173 = vmatpush3.bf16.msra.mxu0 %v4994_v43  ;;  %3833 = vmatprep.mubr.msk.f32.mxu0 %vm4486_vm5, %v4487_v21 }
 0x592   : > { %4174 = vmatprep.subr.bf16.mxu0 %v4485_v18 }
 0x595   : > { %4176 = vmatpush3.bf16.msra.mxu0 %v5000_v48 }
 0x596   : > { %4177 = vmatprep.subr.bf16.mxu0 %v4485_v18 }
 0x599   : > { %v4404_v55 = vpop.eup %4403  ;;  %4179 = vmatpush3.bf16.msra.mxu0 %v5010_v51 }
 0x59a   : > { %3815 = vmatmul.mubr.msk.f32.vlgmr.msra.gmra.mrb[10].mxu1 %vm69_vm3, %v4404_v55  ;;  %4180 = vmatprep.subr.bf16.mxu0 %v4485_v18 }
 0x59b   : > { %4194 = vmatpush3.bf16.msra.mxu1 %v5055_v3  ;;  %3863 = vmatprep.mubr.msk.f32.mxu1 %vm4486_vm5, %v4487_v21 }
 0x59c   : > { %4195 = vmatprep.subr.bf16.mxu1 %v4485_v18 }
 0x59d   : > { %4182 = vmatpush3.bf16.msra.mxu0 %v5037_v61 }
 0x59e   : > { %4183 = vmatprep.subr.bf16.mxu0 %v4485_v18 }
 0x59f   : > { %4197 = vmatpush3.bf16.msra.mxu1 %v5083_v10 }
 0x5a0   : > { %3834 = vmatmul.mubr.msk.f32.vlgmr.msra.gmra.mrb[8].mxu0 %vm79_vm1, %v4402_v53  ;;  %4198 = vmatprep.subr.bf16.mxu1 %v4485_v18 }
 0x5a1   : > { %4185 = vmatpush3.bf16.msra.mxu0 %v5047_v0  ;;  %3848 = vmatprep.mubr.msk.f32.mxu0 %vm4486_vm5, %v4487_v21 }
 0x5a2   : > { %4186 = vmatprep.subr.bf16.mxu0 %v4485_v18 }
 0x5a3   : > { %4200 = vmatpush3.bf16.msra.mxu1 %v5097_v14 }
 0x5a4   : > { %4201 = vmatprep.subr.bf16.mxu1 %v4485_v18 }
 0x5a5   : > { %4188 = vmatpush3.bf16.msra.mxu0 %v5071_v7 }
 0x5a6   : > { %4189 = vmatprep.subr.bf16.mxu0 %v4485_v18 }
 0x5a9   : > { %4191 = vmatpush3.bf16.msra.mxu0 %v5095_v13 }
 0x5aa   : > { %4219 = vmatprep.subr.bf16.mxu0 %v4485_v18 }
 0x663   : > { %v1773_v56 = vpop.f32.mrb[6].mxu0 }
 0x664   : > { %v1779_v59 = vmul.f32 0.05, %v1773_v56  ;;  %v3779_v60 = vpop.f32.mrb[7].mxu0 }
 0x666   : > { %v5335_v40 = vadd.f32 %v1779_v59, %v1778_v57 }
 0x668   : > { %4405 = vtanh.f32 %v5335_v40 }
 0x66d   : > { %v2016_v62 = vpop.f32.mrb[10].mxu1 }
 0x66e   : > { %v2021_v1 = vmul.f32 0.125, %v2016_v62  ;;  %v3816_v2 = vpop.f32.mrb[11].mxu1 }
 0x670   : > { %v5339_v4 = vadd.f32 %v2021_v1, %v2020_v63 }
 0x672   : > { %v4406_v5 = vpop.eup %4405  ;;  %4407 = vtanh.f32 %v5339_v4 }
 0x673   : > { %3213 = vst.msk [vmem:[%s5248_s0 + $0x8] sm:$0xff] %vm84_vm2, %v4406_v5 }
 0x67c   : > { %v4408_v6 = vpop.eup %4407 }
 0x67d   : > { %3849 = vmatmul.mubr.msk.f32.vlgmr.msra.gmra.mrb[8].mxu0 %vm74_vm0, %v4408_v6  ;;  %3864 = vmatmul.mubr.msk.f32.vlgmr.msra.gmra.mrb[12].mxu1 %vm74_vm0, %v4408_v6 }
 0x67e   : > { %4221 = vmatpush3.bf16.msra.mxu0 %v4913_v19  ;;  %4203 = vmatpush3.bf16.msra.mxu1 %v5115_v27 }
 0x67f   : > { %4222 = vmatprep.subr.bf16.mxu0 %v4485_v18  ;;  %4204 = vmatprep.subr.bf16.mxu1 %v4485_v18 }
 0x680   : > { %3904 = vmatprep.mubr.msk.f32.mxu0 %vm4486_vm5, %v4487_v21  ;;  %3874 = vmatprep.mubr.msk.f32.mxu1 %vm4486_vm5, %v4487_v21 }
 0x682   : > { %4224 = vmatpush3.bf16.msra.mxu0 %v4924_v22  ;;  %4206 = vmatpush3.bf16.msra.mxu1 %v5127_v32  ;;  %v2181_v22 = vmul.f32 0.8333333, %v5297_v30 }
 0x683   : > { %4225 = vmatprep.subr.bf16.mxu0 %v4485_v18  ;;  %4207 = vmatprep.subr.bf16.mxu1 %v4485_v18 }
 0x685   : > { %3905 = vmatmul.mubr.msk.f32.vlgmr.msra.gmra.mrb[10].mxu0 %vm69_vm3, %v4404_v55  ;;  %3875 = vmatmul.mubr.msk.f32.vlgmr.msra.gmra.mrb[12].mxu1 %vm69_vm3, %v4404_v55 }
 0x686   : > { %4227 = vmatpush3.bf16.msra.mxu0 %v4934_v25  ;;  %3919 = vmatprep.mubr.msk.f32.mxu0 %vm4486_vm5, %v4487_v21 }
 0x687   : > { %4228 = vmatprep.subr.bf16.mxu0 %v4485_v18  ;;  %4209 = vmatpush3.bf16.msra.mxu1 %v5166_v36 }
 0x688   : > { %4210 = vmatprep.subr.bf16.mxu1 %v4485_v18  ;;  %3893 = vmatprep.mubr.msk.f32.mxu1 %vm4486_vm5, %v4487_v21 }
 0x68a   : > { %4230 = vmatpush3.bf16.msra.mxu0 %v4948_v28 }
 0x68b   : > { %4231 = vmatprep.subr.bf16.mxu0 %v4485_v18  ;;  %4212 = vmatpush3.bf16.msra.mxu1 %v5176_v41 }
 0x68c   : > { %4213 = vmatprep.subr.bf16.mxu1 %v4485_v18 }
 0x68e   : > { %4233 = vmatpush3.bf16.msra.mxu0 %v4958_v31 }
 0x68f   : > { %4215 = vmatpush3.bf16.msra.mxu1 %v5186_v50  ;;  %4234 = vmatprep.subr.bf16.mxu0 %v4485_v18 }
 0x690   : > { %4216 = vmatprep.subr.bf16.mxu1 %v4485_v18 }
 0x691   : > { %3920 = vmatmul.mubr.msk.f32.vlgmr.msra.gmra.mrb[12].mxu0 %vm74_vm0, %v4408_v6 }
 0x692   : > { %4236 = vmatpush3.bf16.msra.mxu0 %v4968_v34  ;;  %3930 = vmatprep.mubr.msk.f32.mxu0 %vm4486_vm5, %v4487_v21  ;;  %v3230_v34 = vld [vmem:[%s5018_s30 + $0x18] sm:$0xff] }
 0x693   : > { %4218 = vmatpush3.bf16.msra.mxu1 %v5196_v54  ;;  %4237 = vmatprep.subr.bf16.mxu0 %v4485_v18 }
 0x694   : > { %4240 = vmatprep.subr.bf16.mxu1 %v4485_v18 }
 0x696   : > { %4239 = vmatpush3.bf16.msra.mxu0 %v4978_v37 }
 0x697   : > { %4261 = vmatprep.subr.bf16.mxu0 %v4485_v18 }
 0x750   : > { %v2177_v19 = vpop.f32.mrb[8].mxu0 }
 0x751   : > { %v2182_v25 = vmul.f32 0.16666667, %v2177_v19  ;;  %v3850_v28 = vpop.f32.mrb[9].mxu0 }
 0x753   : > { %v5386_v31 = vadd.f32 %v2182_v25, %v2181_v22 }
 0x755   : > { %4409 = vtanh.f32 %v5386_v31 }
 0x758   : > { %v2497_v44 = vpop.f32.mrb[10].mxu0 }
 0x759   : > { %v2501_v58 = vadd.f32 %v3230_v34, %v2497_v44  ;;  %v3906_v45 = vpop.f32.mrb[11].mxu0 }
 0x75b   : > { %v2503_v9 = vmul.f32 0.1, %v2501_v58 }
 0x75d   : > { %v5391_v11 = vadd.f32 %v2503_v9, %v2502_v8  }
 0x75f   : > { %v4410_v37 = vpop.eup %4409  ;;  %4411 = vtanh.f32 %v5391_v11  ;;  %3062 = vst.msk [vmem:[%s5518_s18] sm:$0xff] (%p483_p0), %vm69_vm3, %v5391_v11 }
 0x760   : > { %3894 = vmatmul.mubr.msk.f32.vlgmr.msra.gmra.mrb[12].mxu1 %vm79_vm1, %v4410_v37 }
 0x761   : > { %4242 = vmatpush3.bf16.msra.mxu1 %v4994_v43  ;;  %3949 = vmatprep.mubr.msk.f32.mxu1 %vm4486_vm5, %v4487_v21 }
 0x762   : > { %4243 = vmatprep.subr.bf16.mxu1 %v4485_v18 }
 0x765   : > { %4245 = vmatpush3.bf16.msra.mxu1 %v5000_v48  ;;  %v2417_v48 = vmul.f32 0.95, %v5335_v40  ;;  %v5551_v40 = vmov %v5391_v11 }
 0x766   : > { %4246 = vmatprep.subr.bf16.mxu1 %v4485_v18 }
 0x769   : > { %v5401_v12 = vpop.eup %4411   ;;  %4248 = vmatpush3.bf16.msra.mxu1 %v5010_v51 }
 0x76a   : > { %3931 = vmatmul.mubr.msk.f32.vlgmr.msra.gmra.mrb[12].mxu0 %vm69_vm3, %v5401_v12  ;;  %4249 = vmatprep.subr.bf16.mxu1 %v4485_v18  ;;  %3063 = vst.msk [vmem:[%s5519_s19] sm:$0xff] (%p483_p0), %vm69_vm3, %v5401_v12 }
 0x76b   : > { %4263 = vmatpush3.bf16.msra.mxu0 %v5055_v3  ;;  %3979 = vmatprep.mubr.msk.f32.mxu0 %vm4486_vm5, %v4487_v21 }
 0x76c   : > { %4264 = vmatprep.subr.bf16.mxu0 %v4485_v18 }
 0x76d   : > { %4251 = vmatpush3.bf16.msra.mxu1 %v5037_v61 }
 0x76e   : > { %4252 = vmatprep.subr.bf16.mxu1 %v4485_v18 }
 0x76f   : > { %4266 = vmatpush3.bf16.msra.mxu0 %v5083_v10  ;;  %v2659_v10 = vmul.f32 0.875, %v5339_v4 }
 0x770   : > { %3950 = vmatmul.mubr.msk.f32.vlgmr.msra.gmra.mrb[14].mxu1 %vm79_vm1, %v4410_v37  ;;  %4267 = vmatprep.subr.bf16.mxu0 %v4485_v18 }
 0x771   : > { %4254 = vmatpush3.bf16.msra.mxu1 %v5047_v0  ;;  %3964 = vmatprep.mubr.msk.f32.mxu1 %vm4486_vm5, %v4487_v21 }
 0x772   : > { %4255 = vmatprep.subr.bf16.mxu1 %v4485_v18 }
 0x773   : > { %4269 = vmatpush3.bf16.msra.mxu0 %v5097_v14 }
 0x774   : > { %4270 = vmatprep.subr.bf16.mxu0 %v4485_v18 }
 0x775   : > { %4257 = vmatpush3.bf16.msra.mxu1 %v5071_v7 }
 0x776   : > { %4258 = vmatprep.subr.bf16.mxu1 %v4485_v18 }
 0x779   : > { %4260 = vmatpush3.bf16.msra.mxu1 %v5095_v13 }
 0x833   : > { %v2412_v43 = vpop.f32.mrb[12].mxu1 }
 0x834   : > { %v2418_v51 = vmul.f32 0.05, %v2412_v43  ;;  %v3895_v61 = vpop.f32.mrb[13].mxu1 }
 0x836   : > { %v2419_v0 = vadd.f32 %v2418_v51, %v2417_v48 }
 0x838   : > { %4413 = vtanh.f32 %v2419_v0  ;;  %v3056_v46 = vmul.f32 0.95, %v2419_v0 }
 0x83d   : > { %v2655_v3 = vpop.f32.mrb[12].mxu0 }
 0x83e   : > { %v2660_v14 = vmul.f32 0.125, %v2655_v3  ;;  %v3932_v15 = vpop.f32.mrb[13].mxu0 }
 0x840   : > { %v2661_v16 = vadd.f32 %v2660_v14, %v2659_v10  }
 0x842   : > { %v4414_v17 = vpop.eup %4413  ;;  %4415 = vtanh.f32 %v2661_v16  ;;  %v5549_v42 = vmov %v2661_v16  ;;  %3065 = vst.msk [vmem:[%s5520_s20] sm:$0xff] (%p483_p0), %vm74_vm0, %v2661_v16 }
 0x843   : > { %3227 = vst.msk [vmem:[%s5248_s0 + $0x10] sm:$0xff] %vm84_vm2, %v4414_v17 }
 0x84c   : > { %v4416_v7 = vpop.eup %4415  }
 0x84d   : > { %3965 = vmatmul.mubr.msk.f32.vlgmr.msra.gmra.mrb[14].mxu1 %vm74_vm0, %v4416_v7  ;;  %3980 = vmatmul.mubr.msk.f32.vlgmr.msra.gmra.mrb[14].mxu0 %vm74_vm0, %v4416_v7  ;;  %v5548_v43 = vmov %v4416_v7  ;;  %3066 = vst.msk [vmem:[%s5521_s21] sm:$0xff] (%p483_p0), %vm74_vm0, %v4416_v7 }
 0x84e   : > { %4272 = vmatpush3.bf16.msra.mxu0 %v5115_v27  ;;  %3990 = vmatprep.mubr.msk.f32.mxu0 %vm4486_vm5, %v4487_v21  ;;  %v2820_v27 = vmul.f32 0.8333333, %v5386_v31 }
 0x84f   : > { %4273 = vmatprep.subr.bf16.mxu0 %v4485_v18 }
 0x852   : > { %4275 = vmatpush3.bf16.msra.mxu0 %v5127_v32 }
 0x853   : > { %4276 = vmatprep.subr.bf16.mxu0 %v4485_v18 }
 0x855   : > { %3991 = vmatmul.mubr.msk.f32.vlgmr.msra.gmra.mrb[14].mxu0 %vm69_vm3, %v5401_v12 }
 0x856   : > { %4278 = vmatpush3.bf16.msra.mxu0 %v5166_v36  ;;  %4009 = vmatprep.mubr.msk.f32.mxu0 %vm4486_vm5, %v4487_v21 }
 0x857   : > { %4279 = vmatprep.subr.bf16.mxu0 %v4485_v18 }
 0x85a   : > { %4281 = vmatpush3.bf16.msra.mxu0 %v5176_v41 }
 0x85b   : > { %4282 = vmatprep.subr.bf16.mxu0 %v4485_v18 }
 0x85e   : > { %4284 = vmatpush3.bf16.msra.mxu0 %v5186_v50 }
 0x85f   : > { %4285 = vmatprep.subr.bf16.mxu0 %v4485_v18 }
 0x862   : > { %4287 = vmatpush3.bf16.msra.mxu0 %v5196_v54 }
 0x920   : > { %v2816_v13 = vpop.f32.mrb[14].mxu1 }
 0x921   : > { %v2821_v32 = vmul.f32 0.16666667, %v2816_v13  ;;  %v3966_v36 = vpop.f32.mrb[15].mxu1 }
 0x923   : > { %v2822_v20 = vadd.f32 %v2821_v32, %v2820_v27  }
 0x925   : > { %4417 = vtanh.f32 %v2822_v20  ;;  %v5547_v44 = vmov %v2822_v20  ;;  %3068 = vst.msk [vmem:[%s5522_s22] sm:$0xff] (%p483_p0), %vm79_vm1, %v2822_v20 }
 0x92f   : > { %v4418_v21 = vpop.eup %4417  }
 0x930   : > { %4010 = vmatmul.mubr.msk.f32.vlgmr.msra.gmra.mrb[14].mxu0 %vm79_vm1, %v4418_v21  ;;  %v5546_v45 = vmov %v4418_v21  ;;  %3069 = vst.msk [vmem:[%s5523_s23] sm:$0xff] (%p483_p0), %vm79_vm1, %v4418_v21 }
 0xa03   : > { %v3051_v41 = vpop.f32.mrb[14].mxu0 }
 0xa04   : > { %v3057_v24 = vmul.f32 0.05, %v3051_v41  ;;  %v4011_v23 = vpop.f32.mrb[15].mxu0  ;;  %v5550_v41 = vmov %v5401_v12 }
 0xa06   : > { %v3058_v50 = vadd.f32 %v3057_v24, %v3056_v46  }
 0xa08   : > { %4419 = vtanh.f32 %v3058_v50  ;;  %v5545_v46 = vmov %v3058_v50  ;;  %3071 = vst.msk [vmem:[%s5525_s24] sm:$0xff] (%p483_p0), %vm84_vm2, %v3058_v50 }
 0xa0d   :  { %485 = sbr.rel (!%p483_p0) target bundleno = 261 (0x105), region = 163 }
 0xa12   : > { %v4420_v18 = vpop.eup %4419 }
 0xa13   : > { %3241 = vst.msk [vmem:[%s5248_s0 + $0x18] sm:$0xff] %vm84_vm2, %v4420_v18 }

</bundles_post_ra>
